<compile_context>
chip_gen: v5e
topology: v5e:2x2
jax: 0.10.0
libtpu: 0.0.40
codegen_flags: <defaults>
</compile_context>

<pallas_src>
import jax
import jax.numpy as jnp
import numpy as np
from jax.experimental import pallas as pl
from jax.experimental.pallas import tpu as pltpu

NUM_CLASSES = 19        # e.g. Cityscapes palette length
C_IN = 3
LANES = 128
ROW_ALIGN = 32          # uint8 native sublane tile -> keep pixel-rows 32-aligned
MAX_TILE_ROWS = 1024    # 1024 rows * 128 lanes = 131072 pixels per grid step

_MEAN = 255.0 * np.array([0.485, 0.456, 0.406], dtype=np.float32)
_STD = 255.0 * np.array([0.229, 0.224, 0.225], dtype=np.float32)


def _round_up(n, m):
    return ((n + m - 1) // m) * m


def _semseg_kernel(w_ref, b_ref, x_ref, o_ref):
    """w_ref: (3, K) SMEM, b_ref: (K,) SMEM, x_ref: (3, TR, 128), o_ref: (TR, 128) uint8."""
    # Pixel planes, pixels on lanes.  Cast handles uint8 or f32 input alike.
    x0 = x_ref[0].astype(jnp.float32)
    x1 = x_ref[1].astype(jnp.float32)
    x2 = x_ref[2].astype(jnp.float32)

    n_cls = w_ref.shape[1]

    def logit(k):
        # Scalar weights broadcast from SMEM; normalization already folded in.
        return (x0 * w_ref[0, k] + x1 * w_ref[1, k] + x2 * w_ref[2, k]) + b_ref[k]

    # Running argmax over classes (softmax dropped: monotone, argmax unchanged).
    # Strict '>' keeps the first occurrence on ties, matching torch.argmax, and
    # never lets NaN logits win (class id stays in range).
    best_val = logit(0)
    best_idx = jnp.zeros(best_val.shape, jnp.int32)
    for k in range(1, n_cls):
        v = logit(k)
        better = v > best_val
        best_val = jnp.where(better, v, best_val)
        best_idx = jnp.where(better, k, best_idx)

    o_ref[...] = best_idx.astype(jnp.uint8)   # lane-dense uint8 store


def semseg_forward(x, weight, bias):
    """x: (N, H, W, 3) NHWC, float32 (or uint8) with values in [0, 255]."""
    N, H, W, C = x.shape
    assert C == C_IN
    M = N * H * W

    # NHWC -> channel-planar (3, M).  This is the permute(0,3,1,2).contiguous()
    # HBM pass from the PyTorch forward, done once on the host side.
    x_planar = jnp.transpose(x, (3, 0, 1, 2)).reshape(C_IN, M)

    # Pad pixel count to a multiple of 32*128 so blocks match the uint8 native
    # tile; padded pixels produce an in-range class id and are sliced off.
    m_pad = _round_up(M, ROW_ALIGN * LANES)
    if m_pad != M:
        x_planar = jnp.pad(x_planar, ((0, 0), (0, m_pad - M)))
    rows = m_pad // LANES
    x_planar = x_planar.reshape(C_IN, rows, LANES)

    # Fold (x - mean)/std into the 1x1 head: W' = W/std, b' = b - (mean/std)@W.
    inv_std = jnp.asarray(1.0 / _STD, jnp.float32)
    w32 = weight.astype(jnp.float32)
    w_fold = w32 * inv_std[:, None]                                   # (3, K)
    b_fold = bias.astype(jnp.float32) - jnp.asarray(_MEAN / _STD, jnp.float32) @ w32  # (K,)

    # Tile: biggest that fits, but keep >=2 grid steps when there is enough
    # work so v7x's two TensorCores both get a share of the "parallel" axis.
    tr = min(MAX_TILE_ROWS, rows)
    if pl.cdiv(rows, tr) < 2 and rows >= 2 * ROW_ALIGN:
        tr = _round_up(pl.cdiv(rows, 2), ROW_ALIGN)
    grid = (pl.cdiv(rows, tr),)

    out = pl.pallas_call(
        _semseg_kernel,
        out_shape=jax.ShapeDtypeStruct((rows, LANES), jnp.uint8),
        grid=grid,
        in_specs=[
            pl.BlockSpec(memory_space=pltpu.MemorySpace.SMEM),        # folded weight (3, K)
            pl.BlockSpec(memory_space=pltpu.MemorySpace.SMEM),        # folded bias (K,)
            pl.BlockSpec((C_IN, tr, LANES), lambda i: (0, i, 0)),     # pixel planes
        ],
        out_specs=pl.BlockSpec((tr, LANES), lambda i: (i, 0)),        # uint8 class ids
        compiler_params=pltpu.CompilerParams(
            dimension_semantics=("parallel",),
        ),
    )(w_fold, b_fold, x_planar)

    return out.reshape(-1)[:M].reshape(N, H, W)


if __name__ == "__main__":
    key = jax.random.PRNGKey(0)
    k_x, k_w, k_b = jax.random.split(key, 3)

    N, H, W = 2, 16, 16
    x = jax.random.uniform(k_x, (N, H, W, 3), jnp.float32, 0.0, 255.0)
    weight = 0.1 * jax.random.normal(k_w, (C_IN, NUM_CLASSES), jnp.float32)
    bias = 0.1 * jax.random.normal(k_b, (NUM_CLASSES,), jnp.float32)

    out = semseg_forward(x, weight, bias)
    jax.block_until_ready(out)

    assert out.shape == (N, H, W), out.shape
    assert out.dtype == jnp.uint8, out.dtype

    # Reference: original formulation (normalize -> 1x1 conv -> softmax -> argmax).
    xn = (x - _MEAN.reshape(1, 1, 1, 3)) / _STD.reshape(1, 1, 1, 3)
    logits_ref = jnp.einsum("nhwc,ck->nhwk", xn, weight,
                            precision=jax.lax.Precision.HIGHEST) + bias
    ref = jnp.argmax(jax.nn.softmax(logits_ref, axis=-1), axis=-1).astype(jnp.uint8)

    # Folded normalization differs from the reference only at the rounding
    # level; allow either class where the top-2 logit gap is a near-tie.
    srt = jnp.sort(logits_ref, axis=-1)
    gap = srt[..., -1] - srt[..., -2]
    ok = (out == ref) | (gap < 5e-3)
    assert bool(jnp.all(ok)), "mismatch vs reference beyond near-ties"

    print("KERNEL_OK")
</pallas_src>

<mosaic_0001>
module attributes {stable_mosaic.version = 11 : i64} {
  func.func @_semseg_kernel(%arg0: i32, %arg1: memref<3x19xf32, #tpu.memory_space<smem>>, %arg2: memref<19xf32, #tpu.memory_space<smem>>, %arg3: memref<3x32x128xf32, #tpu.memory_space<vmem>>, %arg4: memref<32x128xi8, #tpu.memory_space<vmem>>) attributes {dimension_semantics = [#tpu.dimension_semantics<parallel>], iteration_bounds = array<i64: 1>, scalar_prefetch = 0 : i64, scratch_operands = 0 : i64, tpu.core_type = #tpu.core_type<tc>, window_params = [{transform_indices = @transform_0, window_bounds = array<i64: 3, 19>}, {transform_indices = @transform_1, window_bounds = array<i64: 19>}, {transform_indices = @transform_2, window_bounds = array<i64: 3, 32, 128>}, {transform_indices = @transform_3, window_bounds = array<i64: 32, 128>}]} {
    %c0 = arith.constant 0 : index
    %c0_0 = arith.constant 0 : index
    %c0_1 = arith.constant 0 : index
    %0 = vector.load %arg3[%c0, %c0_0, %c0_1] : memref<3x32x128xf32, #tpu.memory_space<vmem>>, vector<1x32x128xf32>
    %1 = vector.shape_cast %0 : vector<1x32x128xf32> to vector<32x128xf32>
    %c1 = arith.constant 1 : index
    %c0_2 = arith.constant 0 : index
    %c0_3 = arith.constant 0 : index
    %2 = vector.load %arg3[%c1, %c0_2, %c0_3] : memref<3x32x128xf32, #tpu.memory_space<vmem>>, vector<1x32x128xf32>
    %3 = vector.shape_cast %2 : vector<1x32x128xf32> to vector<32x128xf32>
    %c2 = arith.constant 2 : index
    %c0_4 = arith.constant 0 : index
    %c0_5 = arith.constant 0 : index
    %4 = vector.load %arg3[%c2, %c0_4, %c0_5] : memref<3x32x128xf32, #tpu.memory_space<vmem>>, vector<1x32x128xf32>
    %5 = vector.shape_cast %4 : vector<1x32x128xf32> to vector<32x128xf32>
    %c0_6 = arith.constant 0 : index
    %c0_7 = arith.constant 0 : index
    %6 = memref.load %arg1[%c0_6, %c0_7] : memref<3x19xf32, #tpu.memory_space<smem>>
    %7 = vector.broadcast %6 : f32 to vector<32x128xf32>
    %8 = arith.mulf %1, %7 : vector<32x128xf32>
    %c1_8 = arith.constant 1 : index
    %c0_9 = arith.constant 0 : index
    %9 = memref.load %arg1[%c1_8, %c0_9] : memref<3x19xf32, #tpu.memory_space<smem>>
    %10 = vector.broadcast %9 : f32 to vector<32x128xf32>
    %11 = arith.mulf %3, %10 : vector<32x128xf32>
    %12 = arith.addf %8, %11 : vector<32x128xf32>
    %c2_10 = arith.constant 2 : index
    %c0_11 = arith.constant 0 : index
    %13 = memref.load %arg1[%c2_10, %c0_11] : memref<3x19xf32, #tpu.memory_space<smem>>
    %14 = vector.broadcast %13 : f32 to vector<32x128xf32>
    %15 = arith.mulf %5, %14 : vector<32x128xf32>
    %16 = arith.addf %12, %15 : vector<32x128xf32>
    %c0_12 = arith.constant 0 : index
    %17 = memref.load %arg2[%c0_12] : memref<19xf32, #tpu.memory_space<smem>>
    %18 = vector.broadcast %17 : f32 to vector<32x128xf32>
    %19 = arith.addf %16, %18 : vector<32x128xf32>
    %c0_i32 = arith.constant 0 : i32
    %20 = vector.broadcast %c0_i32 : i32 to vector<32x128xi32>
    %c0_13 = arith.constant 0 : index
    %c1_14 = arith.constant 1 : index
    %21 = memref.load %arg1[%c0_13, %c1_14] : memref<3x19xf32, #tpu.memory_space<smem>>
    %22 = vector.broadcast %21 : f32 to vector<32x128xf32>
    %23 = arith.mulf %1, %22 : vector<32x128xf32>
    %c1_15 = arith.constant 1 : index
    %c1_16 = arith.constant 1 : index
    %24 = memref.load %arg1[%c1_15, %c1_16] : memref<3x19xf32, #tpu.memory_space<smem>>
    %25 = vector.broadcast %24 : f32 to vector<32x128xf32>
    %26 = arith.mulf %3, %25 : vector<32x128xf32>
    %27 = arith.addf %23, %26 : vector<32x128xf32>
    %c2_17 = arith.constant 2 : index
    %c1_18 = arith.constant 1 : index
    %28 = memref.load %arg1[%c2_17, %c1_18] : memref<3x19xf32, #tpu.memory_space<smem>>
    %29 = vector.broadcast %28 : f32 to vector<32x128xf32>
    %30 = arith.mulf %5, %29 : vector<32x128xf32>
    %31 = arith.addf %27, %30 : vector<32x128xf32>
    %c1_19 = arith.constant 1 : index
    %32 = memref.load %arg2[%c1_19] : memref<19xf32, #tpu.memory_space<smem>>
    %33 = vector.broadcast %32 : f32 to vector<32x128xf32>
    %34 = arith.addf %31, %33 : vector<32x128xf32>
    %35 = arith.cmpf ogt, %34, %19 : vector<32x128xf32>
    %36 = arith.select %35, %34, %19 : vector<32x128xi1>, vector<32x128xf32>
    %c1_i32 = arith.constant 1 : i32
    %37 = vector.broadcast %c1_i32 : i32 to vector<32x128xi32>
    %38 = arith.select %35, %37, %20 : vector<32x128xi1>, vector<32x128xi32>
    %c0_20 = arith.constant 0 : index
    %c2_21 = arith.constant 2 : index
    %39 = memref.load %arg1[%c0_20, %c2_21] : memref<3x19xf32, #tpu.memory_space<smem>>
    %40 = vector.broadcast %39 : f32 to vector<32x128xf32>
    %41 = arith.mulf %1, %40 : vector<32x128xf32>
    %c1_22 = arith.constant 1 : index
    %c2_23 = arith.constant 2 : index
    %42 = memref.load %arg1[%c1_22, %c2_23] : memref<3x19xf32, #tpu.memory_space<smem>>
    %43 = vector.broadcast %42 : f32 to vector<32x128xf32>
    %44 = arith.mulf %3, %43 : vector<32x128xf32>
    %45 = arith.addf %41, %44 : vector<32x128xf32>
    %c2_24 = arith.constant 2 : index
    %c2_25 = arith.constant 2 : index
    %46 = memref.load %arg1[%c2_24, %c2_25] : memref<3x19xf32, #tpu.memory_space<smem>>
    %47 = vector.broadcast %46 : f32 to vector<32x128xf32>
    %48 = arith.mulf %5, %47 : vector<32x128xf32>
    %49 = arith.addf %45, %48 : vector<32x128xf32>
    %c2_26 = arith.constant 2 : index
    %50 = memref.load %arg2[%c2_26] : memref<19xf32, #tpu.memory_space<smem>>
    %51 = vector.broadcast %50 : f32 to vector<32x128xf32>
    %52 = arith.addf %49, %51 : vector<32x128xf32>
    %53 = arith.cmpf ogt, %52, %36 : vector<32x128xf32>
    %54 = arith.select %53, %52, %36 : vector<32x128xi1>, vector<32x128xf32>
    %c2_i32 = arith.constant 2 : i32
    %55 = vector.broadcast %c2_i32 : i32 to vector<32x128xi32>
    %56 = arith.select %53, %55, %38 : vector<32x128xi1>, vector<32x128xi32>
    %c0_27 = arith.constant 0 : index
    %c3 = arith.constant 3 : index
    %57 = memref.load %arg1[%c0_27, %c3] : memref<3x19xf32, #tpu.memory_space<smem>>
    %58 = vector.broadcast %57 : f32 to vector<32x128xf32>
    %59 = arith.mulf %1, %58 : vector<32x128xf32>
    %c1_28 = arith.constant 1 : index
    %c3_29 = arith.constant 3 : index
    %60 = memref.load %arg1[%c1_28, %c3_29] : memref<3x19xf32, #tpu.memory_space<smem>>
    %61 = vector.broadcast %60 : f32 to vector<32x128xf32>
    %62 = arith.mulf %3, %61 : vector<32x128xf32>
    %63 = arith.addf %59, %62 : vector<32x128xf32>
    %c2_30 = arith.constant 2 : index
    %c3_31 = arith.constant 3 : index
    %64 = memref.load %arg1[%c2_30, %c3_31] : memref<3x19xf32, #tpu.memory_space<smem>>
    %65 = vector.broadcast %64 : f32 to vector<32x128xf32>
    %66 = arith.mulf %5, %65 : vector<32x128xf32>
    %67 = arith.addf %63, %66 : vector<32x128xf32>
    %c3_32 = arith.constant 3 : index
    %68 = memref.load %arg2[%c3_32] : memref<19xf32, #tpu.memory_space<smem>>
    %69 = vector.broadcast %68 : f32 to vector<32x128xf32>
    %70 = arith.addf %67, %69 : vector<32x128xf32>
    %71 = arith.cmpf ogt, %70, %54 : vector<32x128xf32>
    %72 = arith.select %71, %70, %54 : vector<32x128xi1>, vector<32x128xf32>
    %c3_i32 = arith.constant 3 : i32
    %73 = vector.broadcast %c3_i32 : i32 to vector<32x128xi32>
    %74 = arith.select %71, %73, %56 : vector<32x128xi1>, vector<32x128xi32>
    %c0_33 = arith.constant 0 : index
    %c4 = arith.constant 4 : index
    %75 = memref.load %arg1[%c0_33, %c4] : memref<3x19xf32, #tpu.memory_space<smem>>
    %76 = vector.broadcast %75 : f32 to vector<32x128xf32>
    %77 = arith.mulf %1, %76 : vector<32x128xf32>
    %c1_34 = arith.constant 1 : index
    %c4_35 = arith.constant 4 : index
    %78 = memref.load %arg1[%c1_34, %c4_35] : memref<3x19xf32, #tpu.memory_space<smem>>
    %79 = vector.broadcast %78 : f32 to vector<32x128xf32>
    %80 = arith.mulf %3, %79 : vector<32x128xf32>
    %81 = arith.addf %77, %80 : vector<32x128xf32>
    %c2_36 = arith.constant 2 : index
    %c4_37 = arith.constant 4 : index
    %82 = memref.load %arg1[%c2_36, %c4_37] : memref<3x19xf32, #tpu.memory_space<smem>>
    %83 = vector.broadcast %82 : f32 to vector<32x128xf32>
    %84 = arith.mulf %5, %83 : vector<32x128xf32>
    %85 = arith.addf %81, %84 : vector<32x128xf32>
    %c4_38 = arith.constant 4 : index
    %86 = memref.load %arg2[%c4_38] : memref<19xf32, #tpu.memory_space<smem>>
    %87 = vector.broadcast %86 : f32 to vector<32x128xf32>
    %88 = arith.addf %85, %87 : vector<32x128xf32>
    %89 = arith.cmpf ogt, %88, %72 : vector<32x128xf32>
    %90 = arith.select %89, %88, %72 : vector<32x128xi1>, vector<32x128xf32>
    %c4_i32 = arith.constant 4 : i32
    %91 = vector.broadcast %c4_i32 : i32 to vector<32x128xi32>
    %92 = arith.select %89, %91, %74 : vector<32x128xi1>, vector<32x128xi32>
    %c0_39 = arith.constant 0 : index
    %c5 = arith.constant 5 : index
    %93 = memref.load %arg1[%c0_39, %c5] : memref<3x19xf32, #tpu.memory_space<smem>>
    %94 = vector.broadcast %93 : f32 to vector<32x128xf32>
    %95 = arith.mulf %1, %94 : vector<32x128xf32>
    %c1_40 = arith.constant 1 : index
    %c5_41 = arith.constant 5 : index
    %96 = memref.load %arg1[%c1_40, %c5_41] : memref<3x19xf32, #tpu.memory_space<smem>>
    %97 = vector.broadcast %96 : f32 to vector<32x128xf32>
    %98 = arith.mulf %3, %97 : vector<32x128xf32>
    %99 = arith.addf %95, %98 : vector<32x128xf32>
    %c2_42 = arith.constant 2 : index
    %c5_43 = arith.constant 5 : index
    %100 = memref.load %arg1[%c2_42, %c5_43] : memref<3x19xf32, #tpu.memory_space<smem>>
    %101 = vector.broadcast %100 : f32 to vector<32x128xf32>
    %102 = arith.mulf %5, %101 : vector<32x128xf32>
    %103 = arith.addf %99, %102 : vector<32x128xf32>
    %c5_44 = arith.constant 5 : index
    %104 = memref.load %arg2[%c5_44] : memref<19xf32, #tpu.memory_space<smem>>
    %105 = vector.broadcast %104 : f32 to vector<32x128xf32>
    %106 = arith.addf %103, %105 : vector<32x128xf32>
    %107 = arith.cmpf ogt, %106, %90 : vector<32x128xf32>
    %108 = arith.select %107, %106, %90 : vector<32x128xi1>, vector<32x128xf32>
    %c5_i32 = arith.constant 5 : i32
    %109 = vector.broadcast %c5_i32 : i32 to vector<32x128xi32>
    %110 = arith.select %107, %109, %92 : vector<32x128xi1>, vector<32x128xi32>
    %c0_45 = arith.constant 0 : index
    %c6 = arith.constant 6 : index
    %111 = memref.load %arg1[%c0_45, %c6] : memref<3x19xf32, #tpu.memory_space<smem>>
    %112 = vector.broadcast %111 : f32 to vector<32x128xf32>
    %113 = arith.mulf %1, %112 : vector<32x128xf32>
    %c1_46 = arith.constant 1 : index
    %c6_47 = arith.constant 6 : index
    %114 = memref.load %arg1[%c1_46, %c6_47] : memref<3x19xf32, #tpu.memory_space<smem>>
    %115 = vector.broadcast %114 : f32 to vector<32x128xf32>
    %116 = arith.mulf %3, %115 : vector<32x128xf32>
    %117 = arith.addf %113, %116 : vector<32x128xf32>
    %c2_48 = arith.constant 2 : index
    %c6_49 = arith.constant 6 : index
    %118 = memref.load %arg1[%c2_48, %c6_49] : memref<3x19xf32, #tpu.memory_space<smem>>
    %119 = vector.broadcast %118 : f32 to vector<32x128xf32>
    %120 = arith.mulf %5, %119 : vector<32x128xf32>
    %121 = arith.addf %117, %120 : vector<32x128xf32>
    %c6_50 = arith.constant 6 : index
    %122 = memref.load %arg2[%c6_50] : memref<19xf32, #tpu.memory_space<smem>>
    %123 = vector.broadcast %122 : f32 to vector<32x128xf32>
    %124 = arith.addf %121, %123 : vector<32x128xf32>
    %125 = arith.cmpf ogt, %124, %108 : vector<32x128xf32>
    %126 = arith.select %125, %124, %108 : vector<32x128xi1>, vector<32x128xf32>
    %c6_i32 = arith.constant 6 : i32
    %127 = vector.broadcast %c6_i32 : i32 to vector<32x128xi32>
    %128 = arith.select %125, %127, %110 : vector<32x128xi1>, vector<32x128xi32>
    %c0_51 = arith.constant 0 : index
    %c7 = arith.constant 7 : index
    %129 = memref.load %arg1[%c0_51, %c7] : memref<3x19xf32, #tpu.memory_space<smem>>
    %130 = vector.broadcast %129 : f32 to vector<32x128xf32>
    %131 = arith.mulf %1, %130 : vector<32x128xf32>
    %c1_52 = arith.constant 1 : index
    %c7_53 = arith.constant 7 : index
    %132 = memref.load %arg1[%c1_52, %c7_53] : memref<3x19xf32, #tpu.memory_space<smem>>
    %133 = vector.broadcast %132 : f32 to vector<32x128xf32>
    %134 = arith.mulf %3, %133 : vector<32x128xf32>
    %135 = arith.addf %131, %134 : vector<32x128xf32>
    %c2_54 = arith.constant 2 : index
    %c7_55 = arith.constant 7 : index
    %136 = memref.load %arg1[%c2_54, %c7_55] : memref<3x19xf32, #tpu.memory_space<smem>>
    %137 = vector.broadcast %136 : f32 to vector<32x128xf32>
    %138 = arith.mulf %5, %137 : vector<32x128xf32>
    %139 = arith.addf %135, %138 : vector<32x128xf32>
    %c7_56 = arith.constant 7 : index
    %140 = memref.load %arg2[%c7_56] : memref<19xf32, #tpu.memory_space<smem>>
    %141 = vector.broadcast %140 : f32 to vector<32x128xf32>
    %142 = arith.addf %139, %141 : vector<32x128xf32>
    %143 = arith.cmpf ogt, %142, %126 : vector<32x128xf32>
    %144 = arith.select %143, %142, %126 : vector<32x128xi1>, vector<32x128xf32>
    %c7_i32 = arith.constant 7 : i32
    %145 = vector.broadcast %c7_i32 : i32 to vector<32x128xi32>
    %146 = arith.select %143, %145, %128 : vector<32x128xi1>, vector<32x128xi32>
    %c0_57 = arith.constant 0 : index
    %c8 = arith.constant 8 : index
    %147 = memref.load %arg1[%c0_57, %c8] : memref<3x19xf32, #tpu.memory_space<smem>>
    %148 = vector.broadcast %147 : f32 to vector<32x128xf32>
    %149 = arith.mulf %1, %148 : vector<32x128xf32>
    %c1_58 = arith.constant 1 : index
    %c8_59 = arith.constant 8 : index
    %150 = memref.load %arg1[%c1_58, %c8_59] : memref<3x19xf32, #tpu.memory_space<smem>>
    %151 = vector.broadcast %150 : f32 to vector<32x128xf32>
    %152 = arith.mulf %3, %151 : vector<32x128xf32>
    %153 = arith.addf %149, %152 : vector<32x128xf32>
    %c2_60 = arith.constant 2 : index
    %c8_61 = arith.constant 8 : index
    %154 = memref.load %arg1[%c2_60, %c8_61] : memref<3x19xf32, #tpu.memory_space<smem>>
    %155 = vector.broadcast %154 : f32 to vector<32x128xf32>
    %156 = arith.mulf %5, %155 : vector<32x128xf32>
    %157 = arith.addf %153, %156 : vector<32x128xf32>
    %c8_62 = arith.constant 8 : index
    %158 = memref.load %arg2[%c8_62] : memref<19xf32, #tpu.memory_space<smem>>
    %159 = vector.broadcast %158 : f32 to vector<32x128xf32>
    %160 = arith.addf %157, %159 : vector<32x128xf32>
    %161 = arith.cmpf ogt, %160, %144 : vector<32x128xf32>
    %162 = arith.select %161, %160, %144 : vector<32x128xi1>, vector<32x128xf32>
    %c8_i32 = arith.constant 8 : i32
    %163 = vector.broadcast %c8_i32 : i32 to vector<32x128xi32>
    %164 = arith.select %161, %163, %146 : vector<32x128xi1>, vector<32x128xi32>
    %c0_63 = arith.constant 0 : index
    %c9 = arith.constant 9 : index
    %165 = memref.load %arg1[%c0_63, %c9] : memref<3x19xf32, #tpu.memory_space<smem>>
    %166 = vector.broadcast %165 : f32 to vector<32x128xf32>
    %167 = arith.mulf %1, %166 : vector<32x128xf32>
    %c1_64 = arith.constant 1 : index
    %c9_65 = arith.constant 9 : index
    %168 = memref.load %arg1[%c1_64, %c9_65] : memref<3x19xf32, #tpu.memory_space<smem>>
    %169 = vector.broadcast %168 : f32 to vector<32x128xf32>
    %170 = arith.mulf %3, %169 : vector<32x128xf32>
    %171 = arith.addf %167, %170 : vector<32x128xf32>
    %c2_66 = arith.constant 2 : index
    %c9_67 = arith.constant 9 : index
    %172 = memref.load %arg1[%c2_66, %c9_67] : memref<3x19xf32, #tpu.memory_space<smem>>
    %173 = vector.broadcast %172 : f32 to vector<32x128xf32>
    %174 = arith.mulf %5, %173 : vector<32x128xf32>
    %175 = arith.addf %171, %174 : vector<32x128xf32>
    %c9_68 = arith.constant 9 : index
    %176 = memref.load %arg2[%c9_68] : memref<19xf32, #tpu.memory_space<smem>>
    %177 = vector.broadcast %176 : f32 to vector<32x128xf32>
    %178 = arith.addf %175, %177 : vector<32x128xf32>
    %179 = arith.cmpf ogt, %178, %162 : vector<32x128xf32>
    %180 = arith.select %179, %178, %162 : vector<32x128xi1>, vector<32x128xf32>
    %c9_i32 = arith.constant 9 : i32
    %181 = vector.broadcast %c9_i32 : i32 to vector<32x128xi32>
    %182 = arith.select %179, %181, %164 : vector<32x128xi1>, vector<32x128xi32>
    %c0_69 = arith.constant 0 : index
    %c10 = arith.constant 10 : index
    %183 = memref.load %arg1[%c0_69, %c10] : memref<3x19xf32, #tpu.memory_space<smem>>
    %184 = vector.broadcast %183 : f32 to vector<32x128xf32>
    %185 = arith.mulf %1, %184 : vector<32x128xf32>
    %c1_70 = arith.constant 1 : index
    %c10_71 = arith.constant 10 : index
    %186 = memref.load %arg1[%c1_70, %c10_71] : memref<3x19xf32, #tpu.memory_space<smem>>
    %187 = vector.broadcast %186 : f32 to vector<32x128xf32>
    %188 = arith.mulf %3, %187 : vector<32x128xf32>
    %189 = arith.addf %185, %188 : vector<32x128xf32>
    %c2_72 = arith.constant 2 : index
    %c10_73 = arith.constant 10 : index
    %190 = memref.load %arg1[%c2_72, %c10_73] : memref<3x19xf32, #tpu.memory_space<smem>>
    %191 = vector.broadcast %190 : f32 to vector<32x128xf32>
    %192 = arith.mulf %5, %191 : vector<32x128xf32>
    %193 = arith.addf %189, %192 : vector<32x128xf32>
    %c10_74 = arith.constant 10 : index
    %194 = memref.load %arg2[%c10_74] : memref<19xf32, #tpu.memory_space<smem>>
    %195 = vector.broadcast %194 : f32 to vector<32x128xf32>
    %196 = arith.addf %193, %195 : vector<32x128xf32>
    %197 = arith.cmpf ogt, %196, %180 : vector<32x128xf32>
    %198 = arith.select %197, %196, %180 : vector<32x128xi1>, vector<32x128xf32>
    %c10_i32 = arith.constant 10 : i32
    %199 = vector.broadcast %c10_i32 : i32 to vector<32x128xi32>
    %200 = arith.select %197, %199, %182 : vector<32x128xi1>, vector<32x128xi32>
    %c0_75 = arith.constant 0 : index
    %c11 = arith.constant 11 : index
    %201 = memref.load %arg1[%c0_75, %c11] : memref<3x19xf32, #tpu.memory_space<smem>>
    %202 = vector.broadcast %201 : f32 to vector<32x128xf32>
    %203 = arith.mulf %1, %202 : vector<32x128xf32>
    %c1_76 = arith.constant 1 : index
    %c11_77 = arith.constant 11 : index
    %204 = memref.load %arg1[%c1_76, %c11_77] : memref<3x19xf32, #tpu.memory_space<smem>>
    %205 = vector.broadcast %204 : f32 to vector<32x128xf32>
    %206 = arith.mulf %3, %205 : vector<32x128xf32>
    %207 = arith.addf %203, %206 : vector<32x128xf32>
    %c2_78 = arith.constant 2 : index
    %c11_79 = arith.constant 11 : index
    %208 = memref.load %arg1[%c2_78, %c11_79] : memref<3x19xf32, #tpu.memory_space<smem>>
    %209 = vector.broadcast %208 : f32 to vector<32x128xf32>
    %210 = arith.mulf %5, %209 : vector<32x128xf32>
    %211 = arith.addf %207, %210 : vector<32x128xf32>
    %c11_80 = arith.constant 11 : index
    %212 = memref.load %arg2[%c11_80] : memref<19xf32, #tpu.memory_space<smem>>
    %213 = vector.broadcast %212 : f32 to vector<32x128xf32>
    %214 = arith.addf %211, %213 : vector<32x128xf32>
    %215 = arith.cmpf ogt, %214, %198 : vector<32x128xf32>
    %216 = arith.select %215, %214, %198 : vector<32x128xi1>, vector<32x128xf32>
    %c11_i32 = arith.constant 11 : i32
    %217 = vector.broadcast %c11_i32 : i32 to vector<32x128xi32>
    %218 = arith.select %215, %217, %200 : vector<32x128xi1>, vector<32x128xi32>
    %c0_81 = arith.constant 0 : index
    %c12 = arith.constant 12 : index
    %219 = memref.load %arg1[%c0_81, %c12] : memref<3x19xf32, #tpu.memory_space<smem>>
    %220 = vector.broadcast %219 : f32 to vector<32x128xf32>
    %221 = arith.mulf %1, %220 : vector<32x128xf32>
    %c1_82 = arith.constant 1 : index
    %c12_83 = arith.constant 12 : index
    %222 = memref.load %arg1[%c1_82, %c12_83] : memref<3x19xf32, #tpu.memory_space<smem>>
    %223 = vector.broadcast %222 : f32 to vector<32x128xf32>
    %224 = arith.mulf %3, %223 : vector<32x128xf32>
    %225 = arith.addf %221, %224 : vector<32x128xf32>
    %c2_84 = arith.constant 2 : index
    %c12_85 = arith.constant 12 : index
    %226 = memref.load %arg1[%c2_84, %c12_85] : memref<3x19xf32, #tpu.memory_space<smem>>
    %227 = vector.broadcast %226 : f32 to vector<32x128xf32>
    %228 = arith.mulf %5, %227 : vector<32x128xf32>
    %229 = arith.addf %225, %228 : vector<32x128xf32>
    %c12_86 = arith.constant 12 : index
    %230 = memref.load %arg2[%c12_86] : memref<19xf32, #tpu.memory_space<smem>>
    %231 = vector.broadcast %230 : f32 to vector<32x128xf32>
    %232 = arith.addf %229, %231 : vector<32x128xf32>
    %233 = arith.cmpf ogt, %232, %216 : vector<32x128xf32>
    %234 = arith.select %233, %232, %216 : vector<32x128xi1>, vector<32x128xf32>
    %c12_i32 = arith.constant 12 : i32
    %235 = vector.broadcast %c12_i32 : i32 to vector<32x128xi32>
    %236 = arith.select %233, %235, %218 : vector<32x128xi1>, vector<32x128xi32>
    %c0_87 = arith.constant 0 : index
    %c13 = arith.constant 13 : index
    %237 = memref.load %arg1[%c0_87, %c13] : memref<3x19xf32, #tpu.memory_space<smem>>
    %238 = vector.broadcast %237 : f32 to vector<32x128xf32>
    %239 = arith.mulf %1, %238 : vector<32x128xf32>
    %c1_88 = arith.constant 1 : index
    %c13_89 = arith.constant 13 : index
    %240 = memref.load %arg1[%c1_88, %c13_89] : memref<3x19xf32, #tpu.memory_space<smem>>
    %241 = vector.broadcast %240 : f32 to vector<32x128xf32>
    %242 = arith.mulf %3, %241 : vector<32x128xf32>
    %243 = arith.addf %239, %242 : vector<32x128xf32>
    %c2_90 = arith.constant 2 : index
    %c13_91 = arith.constant 13 : index
    %244 = memref.load %arg1[%c2_90, %c13_91] : memref<3x19xf32, #tpu.memory_space<smem>>
    %245 = vector.broadcast %244 : f32 to vector<32x128xf32>
    %246 = arith.mulf %5, %245 : vector<32x128xf32>
    %247 = arith.addf %243, %246 : vector<32x128xf32>
    %c13_92 = arith.constant 13 : index
    %248 = memref.load %arg2[%c13_92] : memref<19xf32, #tpu.memory_space<smem>>
    %249 = vector.broadcast %248 : f32 to vector<32x128xf32>
    %250 = arith.addf %247, %249 : vector<32x128xf32>
    %251 = arith.cmpf ogt, %250, %234 : vector<32x128xf32>
    %252 = arith.select %251, %250, %234 : vector<32x128xi1>, vector<32x128xf32>
    %c13_i32 = arith.constant 13 : i32
    %253 = vector.broadcast %c13_i32 : i32 to vector<32x128xi32>
    %254 = arith.select %251, %253, %236 : vector<32x128xi1>, vector<32x128xi32>
    %c0_93 = arith.constant 0 : index
    %c14 = arith.constant 14 : index
    %255 = memref.load %arg1[%c0_93, %c14] : memref<3x19xf32, #tpu.memory_space<smem>>
    %256 = vector.broadcast %255 : f32 to vector<32x128xf32>
    %257 = arith.mulf %1, %256 : vector<32x128xf32>
    %c1_94 = arith.constant 1 : index
    %c14_95 = arith.constant 14 : index
    %258 = memref.load %arg1[%c1_94, %c14_95] : memref<3x19xf32, #tpu.memory_space<smem>>
    %259 = vector.broadcast %258 : f32 to vector<32x128xf32>
    %260 = arith.mulf %3, %259 : vector<32x128xf32>
    %261 = arith.addf %257, %260 : vector<32x128xf32>
    %c2_96 = arith.constant 2 : index
    %c14_97 = arith.constant 14 : index
    %262 = memref.load %arg1[%c2_96, %c14_97] : memref<3x19xf32, #tpu.memory_space<smem>>
    %263 = vector.broadcast %262 : f32 to vector<32x128xf32>
    %264 = arith.mulf %5, %263 : vector<32x128xf32>
    %265 = arith.addf %261, %264 : vector<32x128xf32>
    %c14_98 = arith.constant 14 : index
    %266 = memref.load %arg2[%c14_98] : memref<19xf32, #tpu.memory_space<smem>>
    %267 = vector.broadcast %266 : f32 to vector<32x128xf32>
    %268 = arith.addf %265, %267 : vector<32x128xf32>
    %269 = arith.cmpf ogt, %268, %252 : vector<32x128xf32>
    %270 = arith.select %269, %268, %252 : vector<32x128xi1>, vector<32x128xf32>
    %c14_i32 = arith.constant 14 : i32
    %271 = vector.broadcast %c14_i32 : i32 to vector<32x128xi32>
    %272 = arith.select %269, %271, %254 : vector<32x128xi1>, vector<32x128xi32>
    %c0_99 = arith.constant 0 : index
    %c15 = arith.constant 15 : index
    %273 = memref.load %arg1[%c0_99, %c15] : memref<3x19xf32, #tpu.memory_space<smem>>
    %274 = vector.broadcast %273 : f32 to vector<32x128xf32>
    %275 = arith.mulf %1, %274 : vector<32x128xf32>
    %c1_100 = arith.constant 1 : index
    %c15_101 = arith.constant 15 : index
    %276 = memref.load %arg1[%c1_100, %c15_101] : memref<3x19xf32, #tpu.memory_space<smem>>
    %277 = vector.broadcast %276 : f32 to vector<32x128xf32>
    %278 = arith.mulf %3, %277 : vector<32x128xf32>
    %279 = arith.addf %275, %278 : vector<32x128xf32>
    %c2_102 = arith.constant 2 : index
    %c15_103 = arith.constant 15 : index
    %280 = memref.load %arg1[%c2_102, %c15_103] : memref<3x19xf32, #tpu.memory_space<smem>>
    %281 = vector.broadcast %280 : f32 to vector<32x128xf32>
    %282 = arith.mulf %5, %281 : vector<32x128xf32>
    %283 = arith.addf %279, %282 : vector<32x128xf32>
    %c15_104 = arith.constant 15 : index
    %284 = memref.load %arg2[%c15_104] : memref<19xf32, #tpu.memory_space<smem>>
    %285 = vector.broadcast %284 : f32 to vector<32x128xf32>
    %286 = arith.addf %283, %285 : vector<32x128xf32>
    %287 = arith.cmpf ogt, %286, %270 : vector<32x128xf32>
    %288 = arith.select %287, %286, %270 : vector<32x128xi1>, vector<32x128xf32>
    %c15_i32 = arith.constant 15 : i32
    %289 = vector.broadcast %c15_i32 : i32 to vector<32x128xi32>
    %290 = arith.select %287, %289, %272 : vector<32x128xi1>, vector<32x128xi32>
    %c0_105 = arith.constant 0 : index
    %c16 = arith.constant 16 : index
    %291 = memref.load %arg1[%c0_105, %c16] : memref<3x19xf32, #tpu.memory_space<smem>>
    %292 = vector.broadcast %291 : f32 to vector<32x128xf32>
    %293 = arith.mulf %1, %292 : vector<32x128xf32>
    %c1_106 = arith.constant 1 : index
    %c16_107 = arith.constant 16 : index
    %294 = memref.load %arg1[%c1_106, %c16_107] : memref<3x19xf32, #tpu.memory_space<smem>>
    %295 = vector.broadcast %294 : f32 to vector<32x128xf32>
    %296 = arith.mulf %3, %295 : vector<32x128xf32>
    %297 = arith.addf %293, %296 : vector<32x128xf32>
    %c2_108 = arith.constant 2 : index
    %c16_109 = arith.constant 16 : index
    %298 = memref.load %arg1[%c2_108, %c16_109] : memref<3x19xf32, #tpu.memory_space<smem>>
    %299 = vector.broadcast %298 : f32 to vector<32x128xf32>
    %300 = arith.mulf %5, %299 : vector<32x128xf32>
    %301 = arith.addf %297, %300 : vector<32x128xf32>
    %c16_110 = arith.constant 16 : index
    %302 = memref.load %arg2[%c16_110] : memref<19xf32, #tpu.memory_space<smem>>
    %303 = vector.broadcast %302 : f32 to vector<32x128xf32>
    %304 = arith.addf %301, %303 : vector<32x128xf32>
    %305 = arith.cmpf ogt, %304, %288 : vector<32x128xf32>
    %306 = arith.select %305, %304, %288 : vector<32x128xi1>, vector<32x128xf32>
    %c16_i32 = arith.constant 16 : i32
    %307 = vector.broadcast %c16_i32 : i32 to vector<32x128xi32>
    %308 = arith.select %305, %307, %290 : vector<32x128xi1>, vector<32x128xi32>
    %c0_111 = arith.constant 0 : index
    %c17 = arith.constant 17 : index
    %309 = memref.load %arg1[%c0_111, %c17] : memref<3x19xf32, #tpu.memory_space<smem>>
    %310 = vector.broadcast %309 : f32 to vector<32x128xf32>
    %311 = arith.mulf %1, %310 : vector<32x128xf32>
    %c1_112 = arith.constant 1 : index
    %c17_113 = arith.constant 17 : index
    %312 = memref.load %arg1[%c1_112, %c17_113] : memref<3x19xf32, #tpu.memory_space<smem>>
    %313 = vector.broadcast %312 : f32 to vector<32x128xf32>
    %314 = arith.mulf %3, %313 : vector<32x128xf32>
    %315 = arith.addf %311, %314 : vector<32x128xf32>
    %c2_114 = arith.constant 2 : index
    %c17_115 = arith.constant 17 : index
    %316 = memref.load %arg1[%c2_114, %c17_115] : memref<3x19xf32, #tpu.memory_space<smem>>
    %317 = vector.broadcast %316 : f32 to vector<32x128xf32>
    %318 = arith.mulf %5, %317 : vector<32x128xf32>
    %319 = arith.addf %315, %318 : vector<32x128xf32>
    %c17_116 = arith.constant 17 : index
    %320 = memref.load %arg2[%c17_116] : memref<19xf32, #tpu.memory_space<smem>>
    %321 = vector.broadcast %320 : f32 to vector<32x128xf32>
    %322 = arith.addf %319, %321 : vector<32x128xf32>
    %323 = arith.cmpf ogt, %322, %306 : vector<32x128xf32>
    %324 = arith.select %323, %322, %306 : vector<32x128xi1>, vector<32x128xf32>
    %c17_i32 = arith.constant 17 : i32
    %325 = vector.broadcast %c17_i32 : i32 to vector<32x128xi32>
    %326 = arith.select %323, %325, %308 : vector<32x128xi1>, vector<32x128xi32>
    %c0_117 = arith.constant 0 : index
    %c18 = arith.constant 18 : index
    %327 = memref.load %arg1[%c0_117, %c18] : memref<3x19xf32, #tpu.memory_space<smem>>
    %328 = vector.broadcast %327 : f32 to vector<32x128xf32>
    %329 = arith.mulf %1, %328 : vector<32x128xf32>
    %c1_118 = arith.constant 1 : index
    %c18_119 = arith.constant 18 : index
    %330 = memref.load %arg1[%c1_118, %c18_119] : memref<3x19xf32, #tpu.memory_space<smem>>
    %331 = vector.broadcast %330 : f32 to vector<32x128xf32>
    %332 = arith.mulf %3, %331 : vector<32x128xf32>
    %333 = arith.addf %329, %332 : vector<32x128xf32>
    %c2_120 = arith.constant 2 : index
    %c18_121 = arith.constant 18 : index
    %334 = memref.load %arg1[%c2_120, %c18_121] : memref<3x19xf32, #tpu.memory_space<smem>>
    %335 = vector.broadcast %334 : f32 to vector<32x128xf32>
    %336 = arith.mulf %5, %335 : vector<32x128xf32>
    %337 = arith.addf %333, %336 : vector<32x128xf32>
    %c18_122 = arith.constant 18 : index
    %338 = memref.load %arg2[%c18_122] : memref<19xf32, #tpu.memory_space<smem>>
    %339 = vector.broadcast %338 : f32 to vector<32x128xf32>
    %340 = arith.addf %337, %339 : vector<32x128xf32>
    %341 = arith.cmpf ogt, %340, %324 : vector<32x128xf32>
    %c18_i32 = arith.constant 18 : i32
    %342 = vector.broadcast %c18_i32 : i32 to vector<32x128xi32>
    %343 = arith.select %341, %342, %326 : vector<32x128xi1>, vector<32x128xi32>
    %344 = arith.trunci %343 : vector<32x128xi32> to vector<32x128xi8>
    %c0_123 = arith.constant 0 : index
    %c0_124 = arith.constant 0 : index
    %345 = vector.load %arg4[%c0_123, %c0_124] : memref<32x128xi8, #tpu.memory_space<vmem>>, vector<32x128xi8>
    tpu.vector_store %arg4[%c0_123, %c0_124], %344 {strides = array<i32>} : memref<32x128xi8, #tpu.memory_space<vmem>>, vector<32x128xi8>,
    return
  }
  func.func @transform_0(%arg0: i32) -> (i32, i32) {
    %c0_i32 = arith.constant 0 : i32
    %c0_i32_0 = arith.constant 0 : i32
    %c0_i32_1 = arith.constant 0 : i32
    return %c0_i32, %c0_i32_0 : i32, i32
  }
  func.func @transform_1(%arg0: i32) -> i32 {
    %c0_i32 = arith.constant 0 : i32
    %c0_i32_0 = arith.constant 0 : i32
    return %c0_i32 : i32
  }
  func.func @transform_2(%arg0: i32) -> (i32, i32, i32) {
    %c0_i32 = arith.constant 0 : i32
    %c0_i32_0 = arith.constant 0 : i32
    %c0_i32_1 = arith.constant 0 : i32
    return %c0_i32, %arg0, %c0_i32_0 : i32, i32, i32
  }
  func.func @transform_3(%arg0: i32) -> (i32, i32) {
    %c0_i32 = arith.constant 0 : i32
    %c0_i32_0 = arith.constant 0 : i32
    return %arg0, %c0_i32 : i32, i32
  }
}

</mosaic_0001>

<bundles_post_ra>
// kernel: tpu_custom_call.1
= control target key start
LH: loop header
LB: loop body
LE: loop exit
PB: predicated region body
PF: predicated region fallthrough
CT: control target
= control target key end

     0   :  { %8 = vsyncpa [#allocation5], 0  ;;  %s2170_s0 = inlined_call_operand.hbm [shape: f32[3,19], index: 0, kind: input, shape index: {}]   ;;  %s2171_s1 = inlined_call_operand.hbm [shape: f32[19], index: 1, kind: input, shape index: {}]   ;;  %s2172_s2 = inlined_call_operand.hbm [shape: f32[3,32,128], index: 2, kind: input, shape index: {}]   ;;  %s2173_s3 = inlined_call_operand.hbm [shape: u8[32,128], index: 3, kind: output, shape index: {}]  }
   0x1   :  { %9 = vsyncpa [#allocation7], 0 }
   0x2   :  { %10 = vsyncpa [#allocation3], 0 }
   0x3   :  { %11 = vsyncpa [#allocation4], 0  ;;  %s17_s14 = sshll.u32 %s2170_s0, 4  ;;  %s26_s17 = sshll.u32 %s2171_s1, 4  ;;  %s18_s14 = int_to_ptr.hbm [resolvable:$true] %s17_s14  ;;  %s27_s17 = int_to_ptr.hbm [resolvable:$true] %s26_s17 }
   0x4   :  { %s1086_s18 = smov [#allocation2]   ;;  %s1087_s19 = smov [#allocation6]  }
   0x5   :  { %20 = dma.hbm_to_smem %s18_s14, 64, %s1086_s18, [#allocation5]  }
   0x6   :  { %29 = dma.hbm_to_smem %s27_s17, 16, %s1087_s19, [#allocation7]  }
   0x7   :  { %s34_s22 = sshll.u32 %s2172_s2, 4  ;;  %s1088_s23 = smov [#allocation8]   ;;  %s35_s22 = int_to_ptr.hbm [resolvable:$true] %s34_s22 }
   0x8   :  { %s36_s24 = sshll.u32 %s1088_s23, 4  ;;  %s1089_s25 = smov 128   ;;  %s37_s24 = int_to_ptr.vmem [resolvable:$true] %s36_s24 }
   0x9   :  { %s1090_s0 = smov 8  }
   0xa   :  { %42 = dma.hbm_to_vmem [thread:$0]  %s35_s22, 1536, %s37_s24, [#allocation3], %s1089_s25, %s1089_s25, %s1090_s0  }
   0xb   :  { %1078 = dma.done.wait [#allocation5], 64  }
   0xc   :  { %1079 = vsyncadd [#allocation5], 4294967232 }
   0xd   :  { %1080 = dma.done.wait [#allocation7], 16  }
   0xe   :  { %1081 = vsyncadd [#allocation7], 4294967280 }
   0xf   :  { %1082 = dma.done.wait [#allocation3], 1536  }
  0x10   :  { %1083 = vsyncadd [#allocation3], 4294965760 }
  0x11   :  { %55 = sfence }
  0x12   :  { %s70_s1 = sld [smem:[#allocation2]]  ;;  %v1122_v0 = vld [vmem:[#allocation8] sm:$0xff]  ;;  %v1126_v1 = vld [vmem:[#allocation8 + $0x8] sm:$0xff]  ;;  %v1128_v2 = vld [vmem:[#allocation8 + $0x10] sm:$0xff] }
  0x13   :  { %s913_s26 = sld [smem:[#allocation2 + $0x80]]  ;;  %v1130_v3 = vld [vmem:[#allocation8 + $0x18] sm:$0xff]  ;;  %v1134_v4 = vld [vmem:[#allocation8 + $0x20] sm:$0xff]  ;;  %v1136_v5 = vld [vmem:[#allocation8 + $0x28] sm:$0xff] }
  0x14   :  { %s914_s27 = sld [smem:[#allocation2 + $0x100]]  ;;  %v1140_v6 = vld [vmem:[#allocation8 + $0x30] sm:$0xff]  ;;  %v1142_v7 = vld [vmem:[#allocation8 + $0x38] sm:$0xff]  ;;  %v1144_v8 = vld [vmem:[#allocation8 + $0x40] sm:$0xff] }
  0x15   :  { %s1124_s2 = sld [smem:[#allocation6]]  ;;  %v1148_v10 = vld [vmem:[#allocation8 + $0x48] sm:$0xff]  ;;  %v1150_v11 = vld [vmem:[#allocation8 + $0x50] sm:$0xff]  ;;  %v1152_v12 = vld [vmem:[#allocation8 + $0x58] sm:$0xff] }
  0x16   :  { %s1132_s28 = sld [smem:[#allocation2 + $0x1]] }
  0x17   :  { %s1138_s29 = sld [smem:[#allocation2 + $0x81]] }
  0x18   :  { %v71_v9 = vstv %s70_s1  ;;  %s1146_s30 = sld [smem:[#allocation2 + $0x101]] }
  0x19   :  { %v72_v13 = vmul.f32 %v71_v9, %v1122_v0  ;;  %v73_v14 = vmul.f32 %v71_v9, %v1126_v1  ;;  %v74_v15 = vmul.f32 %v71_v9, %v1128_v2  ;;  %v75_v16 = vmul.f32 %v71_v9, %v1130_v3  ;;  %s1162_s4 = sld [smem:[#allocation6 + $0x1]] }
  0x1a   :  { %v77_v17 = vstv %s913_s26  ;;  %v87_v18 = vstv %s914_s27  ;;  %s1168_s5 = sld [smem:[#allocation2 + $0x2]] }
  0x1b   :  { %v78_v19 = vmul.f32 %v77_v17, %v1134_v4  ;;  %v79_v20 = vmul.f32 %v77_v17, %v1136_v5  ;;  %v80_v21 = vmul.f32 %v77_v17, %v1140_v6  ;;  %v81_v22 = vmul.f32 %v77_v17, %v1142_v7  ;;  %s1170_s6 = sld [smem:[#allocation2 + $0x82]] }
  0x1c   :  { %v88_v23 = vmul.f32 %v87_v18, %v1144_v8  ;;  %v89_v24 = vmul.f32 %v87_v18, %v1148_v10  ;;  %v90_v25 = vmul.f32 %v87_v18, %v1150_v11  ;;  %v91_v26 = vmul.f32 %v87_v18, %v1152_v12  ;;  %s1194_s7 = sld [smem:[#allocation2 + $0x102]] }
  0x1d   :  { %v82_v27 = vadd.f32 %v78_v19, %v72_v13  ;;  %v83_v28 = vadd.f32 %v79_v20, %v73_v14  ;;  %v84_v29 = vadd.f32 %v80_v21, %v74_v15  ;;  %v85_v30 = vadd.f32 %v81_v22, %v75_v16  ;;  %s1201_s8 = sld [smem:[#allocation6 + $0x2]] }
  0x1e   :  { %v97_v31 = vstv %s1124_s2  ;;  %v103_v32 = vstv %s1132_s28  ;;  %v109_v33 = vstv %s1138_s29  ;;  %v119_v37 = vstv %s1146_s30  ;;  %s1203_s9 = sld [smem:[#allocation2 + $0x3]] }
  0x1f   :  { %v92_v34 = vadd.f32 %v88_v23, %v82_v27  ;;  %v93_v35 = vadd.f32 %v89_v24, %v83_v28  ;;  %v94_v36 = vadd.f32 %v90_v25, %v84_v29  ;;  %v104_v38 = vmul.f32 %v103_v32, %v1122_v0  ;;  %s924_s10 = sld [smem:[#allocation2 + $0x83]] }
  0x20   :  { %v105_v39 = vmul.f32 %v103_v32, %v1126_v1  ;;  %v106_v40 = vmul.f32 %v103_v32, %v1128_v2  ;;  %v107_v41 = vmul.f32 %v103_v32, %v1130_v3  ;;  %v95_v42 = vadd.f32 %v91_v26, %v85_v30  ;;  %s1233_s11 = sld [smem:[#allocation2 + $0x103]] }
  0x21   :  { %v1180_v43 = vadd.f32 %v97_v31, %v92_v34  ;;  %v1182_v44 = vadd.f32 %v97_v31, %v93_v35  ;;  %v1184_v45 = vadd.f32 %v97_v31, %v94_v36  ;;  %v110_v46 = vmul.f32 %v109_v33, %v1134_v4  ;;  %s1246_s12 = sld [smem:[#allocation6 + $0x3]] }
  0x22   :  { %v111_v47 = vmul.f32 %v109_v33, %v1136_v5  ;;  %v112_v48 = vmul.f32 %v109_v33, %v1140_v6  ;;  %v113_v49 = vmul.f32 %v109_v33, %v1142_v7  ;;  %v120_v50 = vmul.f32 %v119_v37, %v1144_v8  ;;  %s1248_s13 = sld [smem:[#allocation2 + $0x4]] }
  0x23   :  { %v121_v51 = vmul.f32 %v119_v37, %v1148_v10  ;;  %v122_v52 = vmul.f32 %v119_v37, %v1150_v11  ;;  %v123_v53 = vmul.f32 %v119_v37, %v1152_v12  ;;  %v114_v54 = vadd.f32 %v110_v46, %v104_v38  ;;  %s1254_s14 = sld [smem:[#allocation2 + $0x84]] }
  0x24   :  { %v115_v55 = vadd.f32 %v111_v47, %v105_v39  ;;  %v116_v56 = vadd.f32 %v112_v48, %v106_v40  ;;  %v117_v57 = vadd.f32 %v113_v49, %v107_v41  ;;  %v1196_v58 = vadd.f32 %v97_v31, %v95_v42  ;;  %s1288_s15 = sld [smem:[#allocation2 + $0x104]] }
  0x25   :  { %v129_v59 = vstv %s1162_s4  ;;  %v147_v60 = vstv %s1168_s5  ;;  %v153_v61 = vstv %s1170_s6  ;;  %v124_v62 = vadd.f32 %v120_v50, %v114_v54  ;;  %s1302_s16 = sld [smem:[#allocation6 + $0x4]] }
  0x26   :  { %v125_v63 = vadd.f32 %v121_v51, %v115_v55  ;;  %v126_v9 = vadd.f32 %v122_v52, %v116_v56  ;;  %v127_v13 = vadd.f32 %v123_v53, %v117_v57  ;;  %v148_v14 = vmul.f32 %v147_v60, %v1122_v0  ;;  %s1304_s17 = sld [smem:[#allocation2 + $0x5]] }
  0x27   :  { %v149_v15 = vmul.f32 %v147_v60, %v1126_v1  ;;  %v150_v16 = vmul.f32 %v147_v60, %v1128_v2  ;;  %v151_v17 = vmul.f32 %v147_v60, %v1130_v3  ;;  %v130_v18 = vadd.f32 %v129_v59, %v124_v62  ;;  %s1310_s18 = sld [smem:[#allocation2 + $0x85]] }
  0x28   :  { %v131_v19 = vadd.f32 %v129_v59, %v125_v63  ;;  %v132_v20 = vadd.f32 %v129_v59, %v126_v9  ;;  %v133_v21 = vadd.f32 %v129_v59, %v127_v13  ;;  %v154_v22 = vmul.f32 %v153_v61, %v1134_v4  ;;  %s1344_s19 = sld [smem:[#allocation2 + $0x105]] }
  0x29   :  { %v155_v23 = vmul.f32 %v153_v61, %v1136_v5  ;;  %v156_v24 = vmul.f32 %v153_v61, %v1140_v6  ;;  %v157_v25 = vmul.f32 %v153_v61, %v1142_v7  ;;  %vm134_vm0 = vcmp.gt.f32.partialorder %v130_v18, %v1180_v43  ;;  %s1358_s20 = sld [smem:[#allocation6 + $0x5]] }
  0x2a   :  { %vm135_vm1 = vcmp.gt.f32.partialorder %v131_v19, %v1182_v44  ;;  %vm136_vm2 = vcmp.gt.f32.partialorder %v132_v20, %v1184_v45  ;;  %v163_v26 = vstv %s1194_s7  ;;  %vm137_vm3 = vcmp.gt.f32.partialorder %v133_v21, %v1196_v58  ;;  %s1360_s21 = sld [smem:[#allocation2 + $0x6]] }
  0x2b   :  { %v1221_v27 = vsel %vm134_vm0, %v130_v18, %v1180_v43  ;;  %v1226_v28 = vsel %vm135_vm1, %v131_v19, %v1182_v44  ;;  %v1231_v29 = vsel %vm136_vm2, %v132_v20, %v1184_v45  ;;  %v158_v30 = vadd.f32 %v154_v22, %v148_v14  ;;  %s1366_s22 = sld [smem:[#allocation2 + $0x86]] }
  0x2c   :  { %v159_v31 = vadd.f32 %v155_v23, %v149_v15  ;;  %v160_v32 = vadd.f32 %v156_v24, %v150_v16  ;;  %v161_v33 = vadd.f32 %v157_v25, %v151_v17  ;;  %v164_v34 = vmul.f32 %v163_v26, %v1144_v8  ;;  %s1400_s23 = sld [smem:[#allocation2 + $0x106]] }
  0x2d   :  { %v165_v35 = vmul.f32 %v163_v26, %v1148_v10  ;;  %v166_v36 = vmul.f32 %v163_v26, %v1150_v11  ;;  %v167_v37 = vmul.f32 %v163_v26, %v1152_v12  ;;  %v1242_v38 = vsel %vm137_vm3, %v133_v21, %v1196_v58  ;;  %s1414_s24 = sld [smem:[#allocation6 + $0x6]] }
  0x2e   :  { %v173_v39 = vstv %s1201_s8  ;;  %v191_v40 = vstv %s1203_s9  ;;  %v197_v41 = vstv %s924_s10  ;;  %v168_v42 = vadd.f32 %v164_v34, %v158_v30  ;;  %s1416_s25 = sld [smem:[#allocation2 + $0x7]] }
  0x2f   :  { %v169_v46 = vadd.f32 %v165_v35, %v159_v31  ;;  %v170_v47 = vadd.f32 %v166_v36, %v160_v32  ;;  %v171_v48 = vadd.f32 %v167_v37, %v161_v33  ;;  %v192_v49 = vmul.f32 %v191_v40, %v1122_v0  ;;  %s1422_s0 = sld [smem:[#allocation2 + $0x87]] }
  0x30   :  { %v193_v50 = vmul.f32 %v191_v40, %v1126_v1  ;;  %v194_v51 = vmul.f32 %v191_v40, %v1128_v2  ;;  %v195_v52 = vmul.f32 %v191_v40, %v1130_v3  ;;  %v174_v53 = vadd.f32 %v173_v39, %v168_v42  ;;  %s1456_s1 = sld [smem:[#allocation2 + $0x107]] }
  0x31   :  { %v175_v54 = vadd.f32 %v173_v39, %v169_v46  ;;  %v176_v55 = vadd.f32 %v173_v39, %v170_v47  ;;  %v177_v56 = vadd.f32 %v173_v39, %v171_v48  ;;  %v198_v57 = vmul.f32 %v197_v41, %v1134_v4  ;;  %s1470_s26 = sld [smem:[#allocation6 + $0x7]] }
  0x32   :  { %v199_v59 = vmul.f32 %v197_v41, %v1136_v5  ;;  %v200_v60 = vmul.f32 %v197_v41, %v1140_v6  ;;  %v201_v61 = vmul.f32 %v197_v41, %v1142_v7  ;;  %v1091_v62 = vmov 0   ;;  %s1472_s27 = sld [smem:[#allocation2 + $0x8]] }
  0x33   :  { %v142_v63 = vsel %vm134_vm0, 1, %v1091_v62  ;;  %vm178_vm4 = vcmp.gt.f32.partialorder %v174_v53, %v1221_v27  ;;  %vm179_vm5 = vcmp.gt.f32.partialorder %v175_v54, %v1226_v28  ;;  %vm180_vm6 = vcmp.gt.f32.partialorder %v176_v55, %v1231_v29  ;;  %s1478_s2 = sld [smem:[#allocation2 + $0x88]] }
  0x34   :  { %v143_v9 = vsel %vm135_vm1, 1, %v1091_v62  ;;  %v144_v13 = vsel %vm136_vm2, 1, %v1091_v62  ;;  %v145_v14 = vsel %vm137_vm3, 1, %v1091_v62  ;;  %v207_v15 = vstv %s1233_s11  ;;  %s1512_s28 = sld [smem:[#allocation2 + $0x108]] }
  0x35   :  { %vm181_vm7 = vcmp.gt.f32.partialorder %v177_v56, %v1242_v38  ;;  %v1276_v43 = vsel %vm178_vm4, %v174_v53, %v1221_v27  ;;  %v1281_v44 = vsel %vm179_vm5, %v175_v54, %v1226_v28  ;;  %v1286_v45 = vsel %vm180_vm6, %v176_v55, %v1231_v29  ;;  %s1526_s29 = sld [smem:[#allocation6 + $0x8]] }
  0x36   :  { %v202_v58 = vadd.f32 %v198_v57, %v192_v49  ;;  %v203_v16 = vadd.f32 %v199_v59, %v193_v50  ;;  %v204_v17 = vadd.f32 %v200_v60, %v194_v51  ;;  %v205_v18 = vadd.f32 %v201_v61, %v195_v52  ;;  %s1528_s30 = sld [smem:[#allocation2 + $0x9]] }
  0x37   :  { %v208_v19 = vmul.f32 %v207_v15, %v1144_v8  ;;  %v209_v20 = vmul.f32 %v207_v15, %v1148_v10  ;;  %v210_v21 = vmul.f32 %v207_v15, %v1150_v11  ;;  %v211_v22 = vmul.f32 %v207_v15, %v1152_v12  ;;  %s1534_s4 = sld [smem:[#allocation2 + $0x89]] }
  0x38   :  { %v1297_v23 = vsel %vm181_vm7, %v177_v56, %v1242_v38  ;;  %v217_v24 = vstv %s1246_s12  ;;  %v235_v25 = vstv %s1248_s13  ;;  %v241_v26 = vstv %s1254_s14  ;;  %s1568_s5 = sld [smem:[#allocation2 + $0x109]] }
  0x39   :  { %v212_v30 = vadd.f32 %v208_v19, %v202_v58  ;;  %v213_v31 = vadd.f32 %v209_v20, %v203_v16  ;;  %v214_v32 = vadd.f32 %v210_v21, %v204_v17  ;;  %v215_v33 = vadd.f32 %v211_v22, %v205_v18  ;;  %s1582_s6 = sld [smem:[#allocation6 + $0x9]] }
  0x3a   :  { %v236_v34 = vmul.f32 %v235_v25, %v1122_v0  ;;  %v237_v35 = vmul.f32 %v235_v25, %v1126_v1  ;;  %v238_v36 = vmul.f32 %v235_v25, %v1128_v2  ;;  %v239_v37 = vmul.f32 %v235_v25, %v1130_v3  ;;  %s1584_s7 = sld [smem:[#allocation2 + $0xa]] }
  0x3b   :  { %v218_v39 = vadd.f32 %v217_v24, %v212_v30  ;;  %v219_v40 = vadd.f32 %v217_v24, %v213_v31  ;;  %v220_v41 = vadd.f32 %v217_v24, %v214_v32  ;;  %v221_v42 = vadd.f32 %v217_v24, %v215_v33  ;;  %s1590_s8 = sld [smem:[#allocation2 + $0x8a]] }
  0x3c   :  { %v242_v46 = vmul.f32 %v241_v26, %v1134_v4  ;;  %v243_v47 = vmul.f32 %v241_v26, %v1136_v5  ;;  %v244_v48 = vmul.f32 %v241_v26, %v1140_v6  ;;  %v245_v49 = vmul.f32 %v241_v26, %v1142_v7  ;;  %s1624_s9 = sld [smem:[#allocation2 + $0x10a]] }
  0x3d   :  { %v186_v50 = vsel %vm178_vm4, 2, %v142_v63  ;;  %vm222_vm8 = vcmp.gt.f32.partialorder %v218_v39, %v1276_v43  ;;  %vm223_vm9 = vcmp.gt.f32.partialorder %v219_v40, %v1281_v44  ;;  %vm224_vm10 = vcmp.gt.f32.partialorder %v220_v41, %v1286_v45  ;;  %s1638_s10 = sld [smem:[#allocation6 + $0xa]] }
  0x3e   :  { %v187_v51 = vsel %vm179_vm5, 2, %v143_v9  ;;  %v188_v52 = vsel %vm180_vm6, 2, %v144_v13  ;;  %v189_v57 = vsel %vm181_vm7, 2, %v145_v14  ;;  %v251_v59 = vstv %s1288_s15  ;;  %s1640_s11 = sld [smem:[#allocation2 + $0xb]] }
  0x3f   :  { %vm225_vm11 = vcmp.gt.f32.partialorder %v221_v42, %v1297_v23  ;;  %v1332_v27 = vsel %vm222_vm8, %v218_v39, %v1276_v43  ;;  %v1337_v28 = vsel %vm223_vm9, %v219_v40, %v1281_v44  ;;  %v1342_v29 = vsel %vm224_vm10, %v220_v41, %v1286_v45  ;;  %s1646_s12 = sld [smem:[#allocation2 + $0x8b]] }
  0x40   :  { %v246_v38 = vadd.f32 %v242_v46, %v236_v34  ;;  %v247_v53 = vadd.f32 %v243_v47, %v237_v35  ;;  %v248_v54 = vadd.f32 %v244_v48, %v238_v36  ;;  %v249_v55 = vadd.f32 %v245_v49, %v239_v37  ;;  %s1680_s13 = sld [smem:[#allocation2 + $0x10b]] }
  0x41   :  { %v252_v56 = vmul.f32 %v251_v59, %v1144_v8  ;;  %v253_v60 = vmul.f32 %v251_v59, %v1148_v10  ;;  %v254_v61 = vmul.f32 %v251_v59, %v1150_v11  ;;  %v255_v62 = vmul.f32 %v251_v59, %v1152_v12  ;;  %s1694_s14 = sld [smem:[#allocation6 + $0xb]] }
  0x42   :  { %v1353_v63 = vsel %vm225_vm11, %v221_v42, %v1297_v23  ;;  %v261_v9 = vstv %s1302_s16  ;;  %v279_v13 = vstv %s1304_s17  ;;  %v285_v14 = vstv %s1310_s18  ;;  %s1696_s15 = sld [smem:[#allocation2 + $0xc]] }
  0x43   :  { %v256_v15 = vadd.f32 %v252_v56, %v246_v38  ;;  %v257_v58 = vadd.f32 %v253_v60, %v247_v53  ;;  %v258_v16 = vadd.f32 %v254_v61, %v248_v54  ;;  %v259_v17 = vadd.f32 %v255_v62, %v249_v55  ;;  %s1702_s16 = sld [smem:[#allocation2 + $0x8c]] }
  0x44   :  { %v280_v18 = vmul.f32 %v279_v13, %v1122_v0  ;;  %v281_v19 = vmul.f32 %v279_v13, %v1126_v1  ;;  %v282_v20 = vmul.f32 %v279_v13, %v1128_v2  ;;  %v283_v21 = vmul.f32 %v279_v13, %v1130_v3  ;;  %s1749_s17 = sld [smem:[#allocation2 + $0x10c]] }
  0x45   :  { %v262_v22 = vadd.f32 %v261_v9, %v256_v15  ;;  %v263_v24 = vadd.f32 %v261_v9, %v257_v58  ;;  %v264_v25 = vadd.f32 %v261_v9, %v258_v16  ;;  %v265_v26 = vadd.f32 %v261_v9, %v259_v17  ;;  %s1765_s18 = sld [smem:[#allocation6 + $0xc]] }
  0x46   :  { %v286_v30 = vmul.f32 %v285_v14, %v1134_v4  ;;  %v287_v31 = vmul.f32 %v285_v14, %v1136_v5  ;;  %v288_v32 = vmul.f32 %v285_v14, %v1140_v6  ;;  %v289_v33 = vmul.f32 %v285_v14, %v1142_v7 }
  0x47   :  { %v230_v34 = vsel %vm222_vm8, 3, %v186_v50  ;;  %vm266_vm12 = vcmp.gt.f32.partialorder %v262_v22, %v1332_v27  ;;  %vm267_vm13 = vcmp.gt.f32.partialorder %v263_v24, %v1337_v28  ;;  %vm268_vm14 = vcmp.gt.f32.partialorder %v264_v25, %v1342_v29 }
  0x48   :  { %v231_v35 = vsel %vm223_vm9, 3, %v187_v51  ;;  %v232_v36 = vsel %vm224_vm10, 3, %v188_v52  ;;  %v233_v37 = vsel %vm225_vm11, 3, %v189_v57  ;;  %v295_v46 = vstv %s1344_s19  ;;  %s1767_s19 = sld [smem:[#allocation2 + $0xd]] }
  0x49   :  { %vm269_vm15 = vcmp.gt.f32.partialorder %v265_v26, %v1353_v63  ;;  %v1388_v43 = vsel %vm266_vm12, %v262_v22, %v1332_v27  ;;  %v1393_v44 = vsel %vm267_vm13, %v263_v24, %v1337_v28  ;;  %v1398_v45 = vsel %vm268_vm14, %v264_v25, %v1342_v29 }
  0x4a   :  { %v290_v23 = vadd.f32 %v286_v30, %v280_v18  ;;  %v291_v39 = vadd.f32 %v287_v31, %v281_v19  ;;  %v292_v40 = vadd.f32 %v288_v32, %v282_v20  ;;  %v293_v41 = vadd.f32 %v289_v33, %v283_v21 }
  0x4b   :  { %v296_v42 = vmul.f32 %v295_v46, %v1144_v8  ;;  %v297_v47 = vmul.f32 %v295_v46, %v1148_v10  ;;  %v298_v48 = vmul.f32 %v295_v46, %v1150_v11  ;;  %v299_v49 = vmul.f32 %v295_v46, %v1152_v12 }
  0x4c   :  { %v1409_v50 = vsel %vm269_vm15, %v265_v26, %v1353_v63  ;;  %v305_v51 = vstv %s1358_s20  ;;  %v323_v52 = vstv %s1360_s21  ;;  %v329_v57 = vstv %s1366_s22  ;;  %s1781_s20 = sld [smem:[#allocation2 + $0x8d]] }
  0x4d   :  { %v300_v59 = vadd.f32 %v296_v42, %v290_v23  ;;  %v301_v38 = vadd.f32 %v297_v47, %v291_v39  ;;  %v302_v53 = vadd.f32 %v298_v48, %v292_v40  ;;  %v303_v54 = vadd.f32 %v299_v49, %v293_v41  ;;  %s1839_s21 = sld [smem:[#allocation2 + $0x10d]] }
  0x4e   :  { %v324_v55 = vmul.f32 %v323_v52, %v1122_v0  ;;  %v325_v56 = vmul.f32 %v323_v52, %v1126_v1  ;;  %v326_v60 = vmul.f32 %v323_v52, %v1128_v2  ;;  %v327_v61 = vmul.f32 %v323_v52, %v1130_v3  ;;  %s1863_s22 = sld [smem:[#allocation6 + $0xd]] }
  0x4f   :  { %v306_v62 = vadd.f32 %v305_v51, %v300_v59  ;;  %v307_v9 = vadd.f32 %v305_v51, %v301_v38  ;;  %v308_v13 = vadd.f32 %v305_v51, %v302_v53  ;;  %v309_v14 = vadd.f32 %v305_v51, %v303_v54 }
  0x50   :  { %v330_v15 = vmul.f32 %v329_v57, %v1134_v4  ;;  %v331_v58 = vmul.f32 %v329_v57, %v1136_v5  ;;  %v332_v16 = vmul.f32 %v329_v57, %v1140_v6  ;;  %v333_v17 = vmul.f32 %v329_v57, %v1142_v7 }
  0x51   :  { %v274_v18 = vsel %vm266_vm12, 4, %v230_v34  ;;  %vm310_vm0 = vcmp.gt.f32.partialorder %v306_v62, %v1388_v43  ;;  %vm311_vm1 = vcmp.gt.f32.partialorder %v307_v9, %v1393_v44  ;;  %vm312_vm2 = vcmp.gt.f32.partialorder %v308_v13, %v1398_v45 }
  0x52   :  { %v275_v19 = vsel %vm267_vm13, 4, %v231_v35  ;;  %v276_v20 = vsel %vm268_vm14, 4, %v232_v36  ;;  %v277_v21 = vsel %vm269_vm15, 4, %v233_v37  ;;  %v339_v30 = vstv %s1400_s23  ;;  %s1865_s23 = sld [smem:[#allocation2 + $0xe]] }
  0x53   :  { %vm313_vm3 = vcmp.gt.f32.partialorder %v309_v14, %v1409_v50  ;;  %v1444_v27 = vsel %vm310_vm0, %v306_v62, %v1388_v43  ;;  %v1449_v28 = vsel %vm311_vm1, %v307_v9, %v1393_v44  ;;  %v1454_v29 = vsel %vm312_vm2, %v308_v13, %v1398_v45 }
  0x54   :  { %v334_v63 = vadd.f32 %v330_v15, %v324_v55  ;;  %v335_v22 = vadd.f32 %v331_v58, %v325_v56  ;;  %v336_v24 = vadd.f32 %v332_v16, %v326_v60  ;;  %v337_v25 = vadd.f32 %v333_v17, %v327_v61 }
  0x55   :  { %v340_v26 = vmul.f32 %v339_v30, %v1144_v8  ;;  %v341_v31 = vmul.f32 %v339_v30, %v1148_v10  ;;  %v342_v32 = vmul.f32 %v339_v30, %v1150_v11  ;;  %v343_v33 = vmul.f32 %v339_v30, %v1152_v12 }
  0x56   :  { %v1465_v34 = vsel %vm313_vm3, %v309_v14, %v1409_v50  ;;  %v349_v35 = vstv %s1414_s24  ;;  %v367_v36 = vstv %s1416_s25  ;;  %v373_v37 = vstv %s1422_s0  ;;  %s1871_s24 = sld [smem:[#allocation2 + $0x8e]] }
  0x57   :  { %v344_v46 = vadd.f32 %v340_v26, %v334_v63  ;;  %v345_v23 = vadd.f32 %v341_v31, %v335_v22  ;;  %v346_v39 = vadd.f32 %v342_v32, %v336_v24  ;;  %v347_v40 = vadd.f32 %v343_v33, %v337_v25  ;;  %s1908_s25 = sld [smem:[#allocation2 + $0x10e]] }
  0x58   :  { %v368_v41 = vmul.f32 %v367_v36, %v1122_v0  ;;  %v369_v42 = vmul.f32 %v367_v36, %v1126_v1  ;;  %v370_v47 = vmul.f32 %v367_v36, %v1128_v2  ;;  %v371_v48 = vmul.f32 %v367_v36, %v1130_v3  ;;  %s1922_s0 = sld [smem:[#allocation6 + $0xe]] }
  0x59   :  { %v350_v49 = vadd.f32 %v349_v35, %v344_v46  ;;  %v351_v51 = vadd.f32 %v349_v35, %v345_v23  ;;  %v352_v52 = vadd.f32 %v349_v35, %v346_v39  ;;  %v353_v57 = vadd.f32 %v349_v35, %v347_v40 }
  0x5a   :  { %v374_v59 = vmul.f32 %v373_v37, %v1134_v4  ;;  %v375_v38 = vmul.f32 %v373_v37, %v1136_v5  ;;  %v376_v53 = vmul.f32 %v373_v37, %v1140_v6  ;;  %v377_v54 = vmul.f32 %v373_v37, %v1142_v7 }
  0x5b   :  { %v318_v55 = vsel %vm310_vm0, 5, %v274_v18  ;;  %vm354_vm4 = vcmp.gt.f32.partialorder %v350_v49, %v1444_v27  ;;  %vm355_vm5 = vcmp.gt.f32.partialorder %v351_v51, %v1449_v28  ;;  %vm356_vm6 = vcmp.gt.f32.partialorder %v352_v52, %v1454_v29 }
  0x5c   :  { %v319_v56 = vsel %vm311_vm1, 5, %v275_v19  ;;  %v320_v60 = vsel %vm312_vm2, 5, %v276_v20  ;;  %v321_v61 = vsel %vm313_vm3, 5, %v277_v21  ;;  %v383_v15 = vstv %s1456_s1  ;;  %s1924_s1 = sld [smem:[#allocation2 + $0xf]] }
  0x5d   :  { %vm357_vm7 = vcmp.gt.f32.partialorder %v353_v57, %v1465_v34  ;;  %v1500_v43 = vsel %vm354_vm4, %v350_v49, %v1444_v27  ;;  %v1505_v44 = vsel %vm355_vm5, %v351_v51, %v1449_v28  ;;  %v1510_v45 = vsel %vm356_vm6, %v352_v52, %v1454_v29 }
  0x5e   :  { %v378_v50 = vadd.f32 %v374_v59, %v368_v41  ;;  %v379_v62 = vadd.f32 %v375_v38, %v369_v42  ;;  %v380_v9 = vadd.f32 %v376_v53, %v370_v47  ;;  %v381_v13 = vadd.f32 %v377_v54, %v371_v48 }
  0x5f   :  { %v384_v14 = vmul.f32 %v383_v15, %v1144_v8  ;;  %v385_v58 = vmul.f32 %v383_v15, %v1148_v10  ;;  %v386_v16 = vmul.f32 %v383_v15, %v1150_v11  ;;  %v387_v17 = vmul.f32 %v383_v15, %v1152_v12 }
  0x60   :  { %v1521_v18 = vsel %vm357_vm7, %v353_v57, %v1465_v34  ;;  %v393_v19 = vstv %s1470_s26  ;;  %v411_v20 = vstv %s1472_s27  ;;  %v417_v21 = vstv %s1478_s2  ;;  %s1930_s26 = sld [smem:[#allocation2 + $0x8f]] }
  0x61   :  { %v388_v30 = vadd.f32 %v384_v14, %v378_v50  ;;  %v389_v63 = vadd.f32 %v385_v58, %v379_v62  ;;  %v390_v22 = vadd.f32 %v386_v16, %v380_v9  ;;  %v391_v24 = vadd.f32 %v387_v17, %v381_v13  ;;  %s1964_s27 = sld [smem:[#allocation2 + $0x10f]] }
  0x62   :  { %v412_v25 = vmul.f32 %v411_v20, %v1122_v0  ;;  %v413_v26 = vmul.f32 %v411_v20, %v1126_v1  ;;  %v414_v31 = vmul.f32 %v411_v20, %v1128_v2  ;;  %v415_v32 = vmul.f32 %v411_v20, %v1130_v3  ;;  %s1978_s2 = sld [smem:[#allocation6 + $0xf]] }
  0x63   :  { %v394_v33 = vadd.f32 %v393_v19, %v388_v30  ;;  %v395_v35 = vadd.f32 %v393_v19, %v389_v63  ;;  %v396_v36 = vadd.f32 %v393_v19, %v390_v22  ;;  %v397_v37 = vadd.f32 %v393_v19, %v391_v24 }
  0x64   :  { %v418_v46 = vmul.f32 %v417_v21, %v1134_v4  ;;  %v419_v23 = vmul.f32 %v417_v21, %v1136_v5  ;;  %v420_v39 = vmul.f32 %v417_v21, %v1140_v6  ;;  %v421_v40 = vmul.f32 %v417_v21, %v1142_v7 }
  0x65   :  { %v362_v41 = vsel %vm354_vm4, 6, %v318_v55  ;;  %vm398_vm8 = vcmp.gt.f32.partialorder %v394_v33, %v1500_v43  ;;  %vm399_vm9 = vcmp.gt.f32.partialorder %v395_v35, %v1505_v44  ;;  %vm400_vm10 = vcmp.gt.f32.partialorder %v396_v36, %v1510_v45 }
  0x66   :  { %v363_v42 = vsel %vm355_vm5, 6, %v319_v56  ;;  %v364_v47 = vsel %vm356_vm6, 6, %v320_v60  ;;  %v365_v48 = vsel %vm357_vm7, 6, %v321_v61  ;;  %v427_v59 = vstv %s1512_s28  ;;  %s1980_s28 = sld [smem:[#allocation2 + $0x10]] }
  0x67   :  { %vm401_vm11 = vcmp.gt.f32.partialorder %v397_v37, %v1521_v18  ;;  %v1556_v27 = vsel %vm398_vm8, %v394_v33, %v1500_v43  ;;  %v1561_v28 = vsel %vm399_vm9, %v395_v35, %v1505_v44  ;;  %v1566_v29 = vsel %vm400_vm10, %v396_v36, %v1510_v45 }
  0x68   :  { %v422_v34 = vadd.f32 %v418_v46, %v412_v25  ;;  %v423_v49 = vadd.f32 %v419_v23, %v413_v26  ;;  %v424_v51 = vadd.f32 %v420_v39, %v414_v31  ;;  %v425_v52 = vadd.f32 %v421_v40, %v415_v32 }
  0x69   :  { %v428_v57 = vmul.f32 %v427_v59, %v1144_v8  ;;  %v429_v38 = vmul.f32 %v427_v59, %v1148_v10  ;;  %v430_v53 = vmul.f32 %v427_v59, %v1150_v11  ;;  %v431_v54 = vmul.f32 %v427_v59, %v1152_v12 }
  0x6a   :  { %v1577_v55 = vsel %vm401_vm11, %v397_v37, %v1521_v18  ;;  %v437_v56 = vstv %s1526_s29  ;;  %v455_v60 = vstv %s1528_s30  ;;  %v461_v61 = vstv %s1534_s4  ;;  %s1986_s29 = sld [smem:[#allocation2 + $0x90]] }
  0x6b   :  { %v432_v15 = vadd.f32 %v428_v57, %v422_v34  ;;  %v433_v50 = vadd.f32 %v429_v38, %v423_v49  ;;  %v434_v62 = vadd.f32 %v430_v53, %v424_v51  ;;  %v435_v9 = vadd.f32 %v431_v54, %v425_v52  ;;  %s2020_s30 = sld [smem:[#allocation2 + $0x110]] }
  0x6c   :  { %v456_v13 = vmul.f32 %v455_v60, %v1122_v0  ;;  %v457_v14 = vmul.f32 %v455_v60, %v1126_v1  ;;  %v458_v58 = vmul.f32 %v455_v60, %v1128_v2  ;;  %v459_v16 = vmul.f32 %v455_v60, %v1130_v3  ;;  %s2034_s4 = sld [smem:[#allocation6 + $0x10]] }
  0x6d   :  { %v438_v17 = vadd.f32 %v437_v56, %v432_v15  ;;  %v439_v19 = vadd.f32 %v437_v56, %v433_v50  ;;  %v440_v20 = vadd.f32 %v437_v56, %v434_v62  ;;  %v441_v21 = vadd.f32 %v437_v56, %v435_v9 }
  0x6e   :  { %v462_v30 = vmul.f32 %v461_v61, %v1134_v4  ;;  %v463_v63 = vmul.f32 %v461_v61, %v1136_v5  ;;  %v464_v22 = vmul.f32 %v461_v61, %v1140_v6  ;;  %v465_v24 = vmul.f32 %v461_v61, %v1142_v7 }
  0x6f   :  { %v406_v25 = vsel %vm398_vm8, 7, %v362_v41  ;;  %vm442_vm12 = vcmp.gt.f32.partialorder %v438_v17, %v1556_v27  ;;  %vm443_vm13 = vcmp.gt.f32.partialorder %v439_v19, %v1561_v28  ;;  %vm444_vm14 = vcmp.gt.f32.partialorder %v440_v20, %v1566_v29 }
  0x70   :  { %v407_v26 = vsel %vm399_vm9, 7, %v363_v42  ;;  %v408_v31 = vsel %vm400_vm10, 7, %v364_v47  ;;  %v409_v32 = vsel %vm401_vm11, 7, %v365_v48  ;;  %v471_v46 = vstv %s1568_s5  ;;  %s2036_s5 = sld [smem:[#allocation2 + $0x11]] }
  0x71   :  { %vm445_vm15 = vcmp.gt.f32.partialorder %v441_v21, %v1577_v55  ;;  %v1612_v43 = vsel %vm442_vm12, %v438_v17, %v1556_v27  ;;  %v1617_v44 = vsel %vm443_vm13, %v439_v19, %v1561_v28  ;;  %v1622_v45 = vsel %vm444_vm14, %v440_v20, %v1566_v29 }
  0x72   :  { %v466_v18 = vadd.f32 %v462_v30, %v456_v13  ;;  %v467_v33 = vadd.f32 %v463_v63, %v457_v14  ;;  %v468_v35 = vadd.f32 %v464_v22, %v458_v58  ;;  %v469_v36 = vadd.f32 %v465_v24, %v459_v16 }
  0x73   :  { %v472_v37 = vmul.f32 %v471_v46, %v1144_v8  ;;  %v473_v23 = vmul.f32 %v471_v46, %v1148_v10  ;;  %v474_v39 = vmul.f32 %v471_v46, %v1150_v11  ;;  %v475_v40 = vmul.f32 %v471_v46, %v1152_v12 }
  0x74   :  { %v1633_v41 = vsel %vm445_vm15, %v441_v21, %v1577_v55  ;;  %v481_v42 = vstv %s1582_s6  ;;  %v499_v47 = vstv %s1584_s7  ;;  %v505_v48 = vstv %s1590_s8  ;;  %s2042_s6 = sld [smem:[#allocation2 + $0x91]] }
  0x75   :  { %v476_v59 = vadd.f32 %v472_v37, %v466_v18  ;;  %v477_v34 = vadd.f32 %v473_v23, %v467_v33  ;;  %v478_v49 = vadd.f32 %v474_v39, %v468_v35  ;;  %v479_v51 = vadd.f32 %v475_v40, %v469_v36  ;;  %s2076_s7 = sld [smem:[#allocation2 + $0x111]] }
  0x76   :  { %v500_v52 = vmul.f32 %v499_v47, %v1122_v0  ;;  %v501_v57 = vmul.f32 %v499_v47, %v1126_v1  ;;  %v502_v38 = vmul.f32 %v499_v47, %v1128_v2  ;;  %v503_v53 = vmul.f32 %v499_v47, %v1130_v3  ;;  %s2090_s8 = sld [smem:[#allocation6 + $0x11]] }
  0x77   :  { %v482_v54 = vadd.f32 %v481_v42, %v476_v59  ;;  %v483_v56 = vadd.f32 %v481_v42, %v477_v34  ;;  %v484_v60 = vadd.f32 %v481_v42, %v478_v49  ;;  %v485_v61 = vadd.f32 %v481_v42, %v479_v51 }
  0x78   :  { %v506_v15 = vmul.f32 %v505_v48, %v1134_v4  ;;  %v507_v50 = vmul.f32 %v505_v48, %v1136_v5  ;;  %v508_v62 = vmul.f32 %v505_v48, %v1140_v6  ;;  %v509_v9 = vmul.f32 %v505_v48, %v1142_v7 }
  0x79   :  { %v450_v13 = vsel %vm442_vm12, 8, %v406_v25  ;;  %vm486_vm0 = vcmp.gt.f32.partialorder %v482_v54, %v1612_v43  ;;  %vm487_vm1 = vcmp.gt.f32.partialorder %v483_v56, %v1617_v44  ;;  %vm488_vm2 = vcmp.gt.f32.partialorder %v484_v60, %v1622_v45 }
  0x7a   :  { %v451_v14 = vsel %vm443_vm13, 8, %v407_v26  ;;  %v452_v58 = vsel %vm444_vm14, 8, %v408_v31  ;;  %v453_v16 = vsel %vm445_vm15, 8, %v409_v32  ;;  %v515_v30 = vstv %s1624_s9  ;;  %s2092_s9 = sld [smem:[#allocation2 + $0x12]] }
  0x7b   :  { %vm489_vm3 = vcmp.gt.f32.partialorder %v485_v61, %v1633_v41  ;;  %v1668_v27 = vsel %vm486_vm0, %v482_v54, %v1612_v43  ;;  %v1673_v28 = vsel %vm487_vm1, %v483_v56, %v1617_v44  ;;  %v1678_v29 = vsel %vm488_vm2, %v484_v60, %v1622_v45 }
  0x7c   :  { %v510_v55 = vadd.f32 %v506_v15, %v500_v52  ;;  %v511_v17 = vadd.f32 %v507_v50, %v501_v57  ;;  %v512_v19 = vadd.f32 %v508_v62, %v502_v38  ;;  %v513_v20 = vadd.f32 %v509_v9, %v503_v53  ;;  %v1772_v62 = vld [vmem:[#allocation8 + $0x8] sm:$0xff] }
  0x7d   :  { %v516_v21 = vmul.f32 %v515_v30, %v1144_v8  ;;  %v517_v63 = vmul.f32 %v515_v30, %v1148_v10  ;;  %v518_v22 = vmul.f32 %v515_v30, %v1150_v11  ;;  %v519_v24 = vmul.f32 %v515_v30, %v1152_v12 }
  0x7e   :  { %v1689_v25 = vsel %vm489_vm3, %v485_v61, %v1633_v41  ;;  %v525_v26 = vstv %s1638_s10  ;;  %v543_v31 = vstv %s1640_s11  ;;  %v549_v32 = vstv %s1646_s12  ;;  %s2098_s10 = sld [smem:[#allocation2 + $0x92]] }
  0x7f   :  { %v520_v46 = vadd.f32 %v516_v21, %v510_v55  ;;  %v521_v18 = vadd.f32 %v517_v63, %v511_v17  ;;  %v522_v33 = vadd.f32 %v518_v22, %v512_v19  ;;  %v523_v35 = vadd.f32 %v519_v24, %v513_v20  ;;  %v1789_v20 = vld [vmem:[#allocation8 + $0x20] sm:$0xff]  ;;  %v1792_v63 = vld [vmem:[#allocation8 + $0x28] sm:$0xff]  ;;  %v1795_v24 = vld [vmem:[#allocation8 + $0x30] sm:$0xff]  ;;  %s2126_s11 = sld [smem:[#allocation2 + $0x112]] }
  0x80   :  { %v544_v36 = vmul.f32 %v543_v31, %v1122_v0  ;;  %v545_v37 = vmul.f32 %v543_v31, %v1126_v1  ;;  %v546_v23 = vmul.f32 %v543_v31, %v1128_v2  ;;  %v547_v39 = vmul.f32 %v543_v31, %v1130_v3  ;;  %v1798_v31 = vld [vmem:[#allocation8 + $0x38] sm:$0xff]  ;;  %s986_s12 = sld [smem:[#allocation6 + $0x12]] }
  0x81   :  { %v526_v40 = vadd.f32 %v525_v26, %v520_v46  ;;  %v1704_v42 = vadd.f32 %v525_v26, %v521_v18  ;;  %v1706_v47 = vadd.f32 %v525_v26, %v522_v33  ;;  %v1708_v48 = vadd.f32 %v525_v26, %v523_v35 }
  0x82   :  { %v550_v59 = vmul.f32 %v549_v32, %v1134_v4  ;;  %v551_v0 = vmul.f32 %v549_v32, %v1136_v5  ;;  %v552_v1 = vmul.f32 %v549_v32, %v1140_v6  ;;  %v553_v2 = vmul.f32 %v549_v32, %v1142_v7 }
  0x83   :  { %v494_v3 = vsel %vm486_vm0, 9, %v450_v13  ;;  %vm530_vm4 = vcmp.gt.f32.partialorder %v526_v40, %v1668_v27  ;;  %vm531_vm5 = vcmp.gt.f32.partialorder %v1704_v42, %v1673_v28  ;;  %vm532_vm6 = vcmp.gt.f32.partialorder %v1706_v47, %v1678_v29  ;;  %v1775_v13 = vld [vmem:[#allocation8 + $0x10] sm:$0xff] }
  0x84   :  { %v495_v4 = vsel %vm487_vm1, 9, %v451_v14  ;;  %v496_v5 = vsel %vm488_vm2, 9, %v452_v58  ;;  %v497_v6 = vsel %vm489_vm3, 9, %v453_v16  ;;  %v559_v7 = vstv %s1680_s13  ;;  %v1778_v58 = vld [vmem:[#allocation8 + $0x18] sm:$0xff]  ;;  %s1092_s13 = smov [#allocation9]  }
  0x85   :  { %vm533_vm7 = vcmp.gt.f32.partialorder %v1708_v48, %v1689_v25  ;;  %v1733_v43 = vsel %vm530_vm4, %v526_v40, %v1668_v27  ;;  %v1740_v44 = vsel %vm531_vm5, %v1704_v42, %v1673_v28  ;;  %v1747_v45 = vsel %vm532_vm6, %v1706_v47, %v1678_v29  ;;  %v1841_v40 = vld [vmem:[#allocation8 + $0x40] sm:$0xff]  ;;  %v1844_v47 = vld [vmem:[#allocation8 + $0x48] sm:$0xff] }
  0x86   :  { %v554_v41 = vadd.f32 %v550_v59, %v544_v36  ;;  %v555_v34 = vadd.f32 %v551_v0, %v545_v37  ;;  %v556_v49 = vadd.f32 %v552_v1, %v546_v23  ;;  %v557_v51 = vadd.f32 %v553_v2, %v547_v39  ;;  %v1847_v59 = vld [vmem:[#allocation8 + $0x50] sm:$0xff]  ;;  %v1850_v1 = vld [vmem:[#allocation8 + $0x58] sm:$0xff] }
  0x87   :  { %v560_v52 = vmul.f32 %v559_v7, %v1144_v8  ;;  %v561_v57 = vmul.f32 %v559_v7, %v1148_v10  ;;  %v562_v38 = vmul.f32 %v559_v7, %v1150_v11  ;;  %v563_v53 = vmul.f32 %v559_v7, %v1152_v12  ;;  %v1769_v11 = vld [vmem:[#allocation8] sm:$0xff] }
  0x88   :  { %v1760_v54 = vsel %vm533_vm7, %v1708_v48, %v1689_v25  ;;  %v569_v56 = vstv %s1694_s14  ;;  %v587_v60 = vstv %s1696_s15  ;;  %v593_v61 = vstv %s1702_s16  ;;  %s899_s14 = sshll.u32 %s1092_s13, 4  ;;  %s900_s14 = int_to_ptr.vmem [resolvable:$true] %s899_s14 }
  0x89   :  { %v564_v15 = vadd.f32 %v560_v52, %v554_v41  ;;  %v565_v8 = vadd.f32 %v561_v57, %v555_v34  ;;  %v566_v50 = vadd.f32 %v562_v38, %v556_v49  ;;  %v567_v10 = vadd.f32 %v563_v53, %v557_v51 }
  0x8a   :  { %v588_v12 = vmul.f32 %v1769_v11, %v587_v60  ;;  %v589_v9 = vmul.f32 %v1772_v62, %v587_v60  ;;  %v590_v14 = vmul.f32 %v1775_v13, %v587_v60  ;;  %v591_v16 = vmul.f32 %v1778_v58, %v587_v60 }
  0x8b   :  { %v570_v30 = vadd.f32 %v569_v56, %v564_v15  ;;  %v1783_v55 = vadd.f32 %v569_v56, %v565_v8  ;;  %v1785_v17 = vadd.f32 %v569_v56, %v566_v50  ;;  %v1787_v19 = vadd.f32 %v569_v56, %v567_v10 }
  0x8c   :  { %v594_v21 = vmul.f32 %v1789_v20, %v593_v61  ;;  %v595_v22 = vmul.f32 %v1792_v63, %v593_v61  ;;  %v596_v26 = vmul.f32 %v1795_v24, %v593_v61  ;;  %v597_v32 = vmul.f32 %v1798_v31, %v593_v61 }
  0x8d   :  { %v538_v46 = vsel %vm530_vm4, 10, %v494_v3  ;;  %vm574_vm8 = vcmp.gt.f32.partialorder %v570_v30, %v1733_v43  ;;  %vm575_vm9 = vcmp.gt.f32.partialorder %v1783_v55, %v1740_v44  ;;  %vm576_vm10 = vcmp.gt.f32.partialorder %v1785_v17, %v1747_v45 }
  0x8e   :  { %v539_v18 = vsel %vm531_vm5, 10, %v495_v4  ;;  %v540_v33 = vsel %vm532_vm6, 10, %v496_v5  ;;  %v541_v27 = vsel %vm533_vm7, 10, %v497_v6  ;;  %v603_v35 = vstv %s1749_s17  ;;  %s901_s17 = sshll.u32 %s2173_s3, 4  ;;  %s902_s17 = int_to_ptr.hbm [resolvable:$true] %s901_s17 }
  0x8f   :  { %vm577_vm11 = vcmp.gt.f32.partialorder %v1787_v19, %v1760_v54  ;;  %v1823_v36 = vsel %vm574_vm8, %v570_v30, %v1733_v43  ;;  %v1830_v28 = vsel %vm575_vm9, %v1783_v55, %v1740_v44  ;;  %v1837_v29 = vsel %vm576_vm10, %v1785_v17, %v1747_v45 }
  0x90   :  { %v598_v25 = vadd.f32 %v594_v21, %v588_v12  ;;  %v599_v37 = vadd.f32 %v595_v22, %v589_v9  ;;  %v600_v23 = vadd.f32 %v596_v26, %v590_v14  ;;  %v601_v39 = vadd.f32 %v597_v32, %v591_v16 }
  0x91   :  { %v604_v42 = vmul.f32 %v1841_v40, %v603_v35  ;;  %v605_v48 = vmul.f32 %v1844_v47, %v603_v35  ;;  %v606_v0 = vmul.f32 %v1847_v59, %v603_v35  ;;  %v607_v2 = vmul.f32 %v1850_v1, %v603_v35 }
  0x92   :  { %v1858_v3 = vsel %vm577_vm11, %v1787_v19, %v1760_v54  ;;  %v613_v4 = vstv %s1765_s18  ;;  %v631_v5 = vstv %s1767_s19  ;;  %v637_v6 = vstv %s1781_s20 }
  0x93   :  { %v608_v7 = vadd.f32 %v604_v42, %v598_v25  ;;  %v609_v41 = vadd.f32 %v605_v48, %v599_v37  ;;  %v610_v34 = vadd.f32 %v606_v0, %v600_v23  ;;  %v611_v49 = vadd.f32 %v607_v2, %v601_v39 }
  0x94   :  { %v632_v51 = vmul.f32 %v1769_v11, %v631_v5  ;;  %v633_v52 = vmul.f32 %v1772_v62, %v631_v5  ;;  %v634_v57 = vmul.f32 %v1775_v13, %v631_v5  ;;  %v635_v38 = vmul.f32 %v1778_v58, %v631_v5 }
  0x95   :  { %v614_v53 = vadd.f32 %v613_v4, %v608_v7  ;;  %v615_v56 = vadd.f32 %v613_v4, %v609_v41  ;;  %v616_v60 = vadd.f32 %v613_v4, %v610_v34  ;;  %v617_v61 = vadd.f32 %v613_v4, %v611_v49 }
  0x96   :  { %v638_v15 = vmul.f32 %v1789_v20, %v637_v6  ;;  %v639_v8 = vmul.f32 %v1792_v63, %v637_v6  ;;  %v640_v50 = vmul.f32 %v1795_v24, %v637_v6  ;;  %v641_v10 = vmul.f32 %v1798_v31, %v637_v6 }
  0x97   :  { %v582_v12 = vsel %vm574_vm8, 11, %v538_v46  ;;  %vm618_vm12 = vcmp.gt.f32.partialorder %v614_v53, %v1823_v36  ;;  %vm619_vm13 = vcmp.gt.f32.partialorder %v615_v56, %v1830_v28  ;;  %vm620_vm14 = vcmp.gt.f32.partialorder %v616_v60, %v1837_v29 }
  0x98   :  { %v583_v9 = vsel %vm575_vm9, 11, %v539_v18  ;;  %v584_v14 = vsel %vm576_vm10, 11, %v540_v33  ;;  %v585_v16 = vsel %vm577_vm11, 11, %v541_v27  ;;  %v647_v43 = vstv %s1839_s21 }
  0x99   :  { %vm621_vm15 = vcmp.gt.f32.partialorder %v617_v61, %v1858_v3  ;;  %v1896_v30 = vsel %vm618_vm12, %v614_v53, %v1823_v36  ;;  %v1901_v44 = vsel %vm619_vm13, %v615_v56, %v1830_v28  ;;  %v1906_v45 = vsel %vm620_vm14, %v616_v60, %v1837_v29 }
  0x9a   :  { %v642_v54 = vadd.f32 %v638_v15, %v632_v51  ;;  %v643_v55 = vadd.f32 %v639_v8, %v633_v52  ;;  %v644_v17 = vadd.f32 %v640_v50, %v634_v57  ;;  %v645_v19 = vadd.f32 %v641_v10, %v635_v38 }
  0x9b   :  { %v648_v21 = vmul.f32 %v1841_v40, %v647_v43  ;;  %v649_v22 = vmul.f32 %v1844_v47, %v647_v43  ;;  %v650_v26 = vmul.f32 %v1847_v59, %v647_v43  ;;  %v651_v32 = vmul.f32 %v1850_v1, %v647_v43 }
  0x9c   :  { %v1917_v46 = vsel %vm621_vm15, %v617_v61, %v1858_v3  ;;  %v657_v18 = vstv %s1863_s22  ;;  %v675_v33 = vstv %s1865_s23  ;;  %v681_v27 = vstv %s1871_s24 }
  0x9d   :  { %v652_v35 = vadd.f32 %v648_v21, %v642_v54  ;;  %v653_v25 = vadd.f32 %v649_v22, %v643_v55  ;;  %v654_v37 = vadd.f32 %v650_v26, %v644_v17  ;;  %v655_v23 = vadd.f32 %v651_v32, %v645_v19 }
  0x9e   :  { %v676_v39 = vmul.f32 %v1769_v11, %v675_v33  ;;  %v677_v42 = vmul.f32 %v1772_v62, %v675_v33  ;;  %v678_v48 = vmul.f32 %v1775_v13, %v675_v33  ;;  %v679_v0 = vmul.f32 %v1778_v58, %v675_v33 }
  0x9f   :  { %v658_v2 = vadd.f32 %v657_v18, %v652_v35  ;;  %v659_v4 = vadd.f32 %v657_v18, %v653_v25  ;;  %v660_v5 = vadd.f32 %v657_v18, %v654_v37  ;;  %v661_v6 = vadd.f32 %v657_v18, %v655_v23 }
  0xa0   :  { %v682_v7 = vmul.f32 %v1789_v20, %v681_v27  ;;  %v683_v41 = vmul.f32 %v1792_v63, %v681_v27  ;;  %v684_v34 = vmul.f32 %v1795_v24, %v681_v27  ;;  %v685_v49 = vmul.f32 %v1798_v31, %v681_v27 }
  0xa1   :  { %v626_v51 = vsel %vm618_vm12, 12, %v582_v12  ;;  %vm662_vm0 = vcmp.gt.f32.partialorder %v658_v2, %v1896_v30  ;;  %vm663_vm1 = vcmp.gt.f32.partialorder %v659_v4, %v1901_v44  ;;  %vm664_vm2 = vcmp.gt.f32.partialorder %v660_v5, %v1906_v45 }
  0xa2   :  { %v627_v52 = vsel %vm619_vm13, 12, %v583_v9  ;;  %v628_v57 = vsel %vm620_vm14, 12, %v584_v14  ;;  %v629_v38 = vsel %vm621_vm15, 12, %v585_v16  ;;  %v691_v15 = vstv %s1908_s25 }
  0xa3   :  { %vm665_vm3 = vcmp.gt.f32.partialorder %v661_v6, %v1917_v46  ;;  %v1952_v36 = vsel %vm662_vm0, %v658_v2, %v1896_v30  ;;  %v1957_v28 = vsel %vm663_vm1, %v659_v4, %v1901_v44  ;;  %v1962_v29 = vsel %vm664_vm2, %v660_v5, %v1906_v45 }
  0xa4   :  { %v686_v3 = vadd.f32 %v682_v7, %v676_v39  ;;  %v687_v53 = vadd.f32 %v683_v41, %v677_v42  ;;  %v688_v56 = vadd.f32 %v684_v34, %v678_v48  ;;  %v689_v60 = vadd.f32 %v685_v49, %v679_v0 }
  0xa5   :  { %v692_v61 = vmul.f32 %v1841_v40, %v691_v15  ;;  %v693_v8 = vmul.f32 %v1844_v47, %v691_v15  ;;  %v694_v50 = vmul.f32 %v1847_v59, %v691_v15  ;;  %v695_v10 = vmul.f32 %v1850_v1, %v691_v15 }
  0xa6   :  { %v1973_v12 = vsel %vm665_vm3, %v661_v6, %v1917_v46  ;;  %v701_v9 = vstv %s1922_s0  ;;  %v719_v14 = vstv %s1924_s1  ;;  %v725_v16 = vstv %s1930_s26 }
  0xa7   :  { %v696_v43 = vadd.f32 %v692_v61, %v686_v3  ;;  %v697_v54 = vadd.f32 %v693_v8, %v687_v53  ;;  %v698_v55 = vadd.f32 %v694_v50, %v688_v56  ;;  %v699_v17 = vadd.f32 %v695_v10, %v689_v60 }
  0xa8   :  { %v720_v19 = vmul.f32 %v1769_v11, %v719_v14  ;;  %v721_v21 = vmul.f32 %v1772_v62, %v719_v14  ;;  %v722_v22 = vmul.f32 %v1775_v13, %v719_v14  ;;  %v723_v26 = vmul.f32 %v1778_v58, %v719_v14 }
  0xa9   :  { %v702_v32 = vadd.f32 %v701_v9, %v696_v43  ;;  %v703_v18 = vadd.f32 %v701_v9, %v697_v54  ;;  %v704_v33 = vadd.f32 %v701_v9, %v698_v55  ;;  %v705_v27 = vadd.f32 %v701_v9, %v699_v17 }
  0xaa   :  { %v726_v35 = vmul.f32 %v1789_v20, %v725_v16  ;;  %v727_v25 = vmul.f32 %v1792_v63, %v725_v16  ;;  %v728_v37 = vmul.f32 %v1795_v24, %v725_v16  ;;  %v729_v23 = vmul.f32 %v1798_v31, %v725_v16 }
  0xab   :  { %v670_v39 = vsel %vm662_vm0, 13, %v626_v51  ;;  %vm706_vm4 = vcmp.gt.f32.partialorder %v702_v32, %v1952_v36  ;;  %vm707_vm5 = vcmp.gt.f32.partialorder %v703_v18, %v1957_v28  ;;  %vm708_vm6 = vcmp.gt.f32.partialorder %v704_v33, %v1962_v29 }
  0xac   :  { %v671_v42 = vsel %vm663_vm1, 13, %v627_v52  ;;  %v672_v48 = vsel %vm664_vm2, 13, %v628_v57  ;;  %v673_v0 = vsel %vm665_vm3, 13, %v629_v38  ;;  %v735_v7 = vstv %s1964_s27 }
  0xad   :  { %vm709_vm7 = vcmp.gt.f32.partialorder %v705_v27, %v1973_v12  ;;  %v2008_v30 = vsel %vm706_vm4, %v702_v32, %v1952_v36  ;;  %v2013_v44 = vsel %vm707_vm5, %v703_v18, %v1957_v28  ;;  %v2018_v45 = vsel %vm708_vm6, %v704_v33, %v1962_v29 }
  0xae   :  { %v730_v46 = vadd.f32 %v726_v35, %v720_v19  ;;  %v731_v2 = vadd.f32 %v727_v25, %v721_v21  ;;  %v732_v4 = vadd.f32 %v728_v37, %v722_v22  ;;  %v733_v5 = vadd.f32 %v729_v23, %v723_v26 }
  0xaf   :  { %v736_v6 = vmul.f32 %v1841_v40, %v735_v7  ;;  %v737_v41 = vmul.f32 %v1844_v47, %v735_v7  ;;  %v738_v34 = vmul.f32 %v1847_v59, %v735_v7  ;;  %v739_v49 = vmul.f32 %v1850_v1, %v735_v7 }
  0xb0   :  { %v2029_v51 = vsel %vm709_vm7, %v705_v27, %v1973_v12  ;;  %v745_v52 = vstv %s1978_s2  ;;  %v763_v57 = vstv %s1980_s28  ;;  %v769_v38 = vstv %s1986_s29 }
  0xb1   :  { %v740_v15 = vadd.f32 %v736_v6, %v730_v46  ;;  %v741_v3 = vadd.f32 %v737_v41, %v731_v2  ;;  %v742_v53 = vadd.f32 %v738_v34, %v732_v4  ;;  %v743_v56 = vadd.f32 %v739_v49, %v733_v5 }
  0xb2   :  { %v764_v60 = vmul.f32 %v1769_v11, %v763_v57  ;;  %v765_v61 = vmul.f32 %v1772_v62, %v763_v57  ;;  %v766_v8 = vmul.f32 %v1775_v13, %v763_v57  ;;  %v767_v50 = vmul.f32 %v1778_v58, %v763_v57 }
  0xb3   :  { %v746_v10 = vadd.f32 %v745_v52, %v740_v15  ;;  %v747_v9 = vadd.f32 %v745_v52, %v741_v3  ;;  %v748_v14 = vadd.f32 %v745_v52, %v742_v53  ;;  %v749_v16 = vadd.f32 %v745_v52, %v743_v56 }
  0xb4   :  { %v770_v43 = vmul.f32 %v1789_v20, %v769_v38  ;;  %v771_v54 = vmul.f32 %v1792_v63, %v769_v38  ;;  %v772_v55 = vmul.f32 %v1795_v24, %v769_v38  ;;  %v773_v17 = vmul.f32 %v1798_v31, %v769_v38 }
  0xb5   :  { %v714_v19 = vsel %vm706_vm4, 14, %v670_v39  ;;  %vm750_vm8 = vcmp.gt.f32.partialorder %v746_v10, %v2008_v30  ;;  %vm751_vm9 = vcmp.gt.f32.partialorder %v747_v9, %v2013_v44  ;;  %vm752_vm10 = vcmp.gt.f32.partialorder %v748_v14, %v2018_v45 }
  0xb6   :  { %v715_v21 = vsel %vm707_vm5, 14, %v671_v42  ;;  %v716_v22 = vsel %vm708_vm6, 14, %v672_v48  ;;  %v717_v26 = vsel %vm709_vm7, 14, %v673_v0  ;;  %v779_v35 = vstv %s2020_s30 }
  0xb7   :  { %vm753_vm11 = vcmp.gt.f32.partialorder %v749_v16, %v2029_v51  ;;  %v2064_v36 = vsel %vm750_vm8, %v746_v10, %v2008_v30  ;;  %v2069_v28 = vsel %vm751_vm9, %v747_v9, %v2013_v44  ;;  %v2074_v29 = vsel %vm752_vm10, %v748_v14, %v2018_v45 }
  0xb8   :  { %v774_v12 = vadd.f32 %v770_v43, %v764_v60  ;;  %v775_v32 = vadd.f32 %v771_v54, %v765_v61  ;;  %v776_v18 = vadd.f32 %v772_v55, %v766_v8  ;;  %v777_v33 = vadd.f32 %v773_v17, %v767_v50 }
  0xb9   :  { %v780_v27 = vmul.f32 %v1841_v40, %v779_v35  ;;  %v781_v25 = vmul.f32 %v1844_v47, %v779_v35  ;;  %v782_v37 = vmul.f32 %v1847_v59, %v779_v35  ;;  %v783_v23 = vmul.f32 %v1850_v1, %v779_v35 }
  0xba   :  { %v2085_v39 = vsel %vm753_vm11, %v749_v16, %v2029_v51  ;;  %v789_v42 = vstv %s2034_s4  ;;  %v807_v48 = vstv %s2036_s5  ;;  %v813_v0 = vstv %s2042_s6 }
  0xbb   :  { %v784_v7 = vadd.f32 %v780_v27, %v774_v12  ;;  %v785_v46 = vadd.f32 %v781_v25, %v775_v32  ;;  %v786_v2 = vadd.f32 %v782_v37, %v776_v18  ;;  %v787_v4 = vadd.f32 %v783_v23, %v777_v33 }
  0xbc   :  { %v808_v5 = vmul.f32 %v1769_v11, %v807_v48  ;;  %v809_v6 = vmul.f32 %v1772_v62, %v807_v48  ;;  %v810_v41 = vmul.f32 %v1775_v13, %v807_v48  ;;  %v811_v34 = vmul.f32 %v1778_v58, %v807_v48 }
  0xbd   :  { %v790_v49 = vadd.f32 %v789_v42, %v784_v7  ;;  %v791_v52 = vadd.f32 %v789_v42, %v785_v46  ;;  %v792_v57 = vadd.f32 %v789_v42, %v786_v2  ;;  %v793_v38 = vadd.f32 %v789_v42, %v787_v4 }
  0xbe   :  { %v814_v15 = vmul.f32 %v1789_v20, %v813_v0  ;;  %v815_v3 = vmul.f32 %v1792_v63, %v813_v0  ;;  %v816_v53 = vmul.f32 %v1795_v24, %v813_v0  ;;  %v817_v56 = vmul.f32 %v1798_v31, %v813_v0 }
  0xbf   :  { %v758_v60 = vsel %vm750_vm8, 15, %v714_v19  ;;  %vm794_vm12 = vcmp.gt.f32.partialorder %v790_v49, %v2064_v36  ;;  %vm795_vm13 = vcmp.gt.f32.partialorder %v791_v52, %v2069_v28  ;;  %vm796_vm14 = vcmp.gt.f32.partialorder %v792_v57, %v2074_v29 }
  0xc0   :  { %v759_v61 = vsel %vm751_vm9, 15, %v715_v21  ;;  %v760_v8 = vsel %vm752_vm10, 15, %v716_v22  ;;  %v761_v50 = vsel %vm753_vm11, 15, %v717_v26  ;;  %v823_v43 = vstv %s2076_s7 }
  0xc1   :  { %vm797_vm15 = vcmp.gt.f32.partialorder %v793_v38, %v2085_v39  ;;  %v798_v30 = vsel %vm794_vm12, %v790_v49, %v2064_v36  ;;  %v799_v44 = vsel %vm795_vm13, %v791_v52, %v2069_v28  ;;  %v800_v45 = vsel %vm796_vm14, %v792_v57, %v2074_v29 }
  0xc2   :  { %v818_v51 = vadd.f32 %v814_v15, %v808_v5  ;;  %v819_v10 = vadd.f32 %v815_v3, %v809_v6  ;;  %v820_v9 = vadd.f32 %v816_v53, %v810_v41  ;;  %v821_v14 = vadd.f32 %v817_v56, %v811_v34 }
  0xc3   :  { %v824_v16 = vmul.f32 %v1841_v40, %v823_v43  ;;  %v825_v54 = vmul.f32 %v1844_v47, %v823_v43  ;;  %v826_v55 = vmul.f32 %v1847_v59, %v823_v43  ;;  %v827_v17 = vmul.f32 %v1850_v1, %v823_v43 }
  0xc4   :  { %v801_v19 = vsel %vm797_vm15, %v793_v38, %v2085_v39  ;;  %v833_v21 = vstv %s2090_s8  ;;  %v851_v22 = vstv %s2092_s9  ;;  %v857_v26 = vstv %s2098_s10 }
  0xc5   :  { %v828_v35 = vadd.f32 %v824_v16, %v818_v51  ;;  %v829_v12 = vadd.f32 %v825_v54, %v819_v10  ;;  %v830_v32 = vadd.f32 %v826_v55, %v820_v9  ;;  %v831_v18 = vadd.f32 %v827_v17, %v821_v14 }
  0xc6   :  { %v852_v33 = vmul.f32 %v1769_v11, %v851_v22  ;;  %v853_v27 = vmul.f32 %v1772_v62, %v851_v22  ;;  %v854_v25 = vmul.f32 %v1775_v13, %v851_v22  ;;  %v855_v37 = vmul.f32 %v1778_v58, %v851_v22 }
  0xc7   :  { %v834_v23 = vadd.f32 %v833_v21, %v828_v35  ;;  %v835_v42 = vadd.f32 %v833_v21, %v829_v12  ;;  %v836_v48 = vadd.f32 %v833_v21, %v830_v32  ;;  %v837_v0 = vadd.f32 %v833_v21, %v831_v18 }
  0xc8   :  { %v858_v7 = vmul.f32 %v1789_v20, %v857_v26  ;;  %v859_v46 = vmul.f32 %v1792_v63, %v857_v26  ;;  %v860_v2 = vmul.f32 %v1795_v24, %v857_v26  ;;  %v861_v11 = vmul.f32 %v1798_v31, %v857_v26 }
  0xc9   :  { %v802_v62 = vsel %vm794_vm12, 16, %v758_v60  ;;  %vm838_vm0 = vcmp.gt.f32.partialorder %v834_v23, %v798_v30  ;;  %v803_v13 = vsel %vm795_vm13, 16, %v759_v61  ;;  %v804_v58 = vsel %vm796_vm14, 16, %v760_v8 }
  0xca   :  { %v805_v4 = vsel %vm797_vm15, 16, %v761_v50  ;;  %v867_v20 = vstv %s2126_s11  ;;  %vm839_vm1 = vcmp.gt.f32.partialorder %v835_v42, %v799_v44  ;;  %vm840_vm2 = vcmp.gt.f32.partialorder %v836_v48, %v800_v45 }
  0xcb   :  { %vm841_vm3 = vcmp.gt.f32.partialorder %v837_v0, %v801_v19  ;;  %v842_v63 = vsel %vm838_vm0, %v834_v23, %v798_v30  ;;  %v862_v24 = vadd.f32 %v858_v7, %v852_v33  ;;  %v863_v31 = vadd.f32 %v859_v46, %v853_v27 }
  0xcc   :  { %v864_v36 = vadd.f32 %v860_v2, %v854_v25  ;;  %v865_v5 = vadd.f32 %v861_v11, %v855_v37  ;;  %v868_v6 = vmul.f32 %v1841_v40, %v867_v20  ;;  %v869_v28 = vmul.f32 %v1844_v47, %v867_v20 }
  0xcd   :  { %v870_v29 = vmul.f32 %v1847_v59, %v867_v20  ;;  %v871_v41 = vmul.f32 %v1850_v1, %v867_v20  ;;  %v843_v39 = vsel %vm839_vm1, %v835_v42, %v799_v44  ;;  %v844_v34 = vsel %vm840_vm2, %v836_v48, %v800_v45 }
  0xce   :  { %v845_v49 = vsel %vm841_vm3, %v837_v0, %v801_v19  ;;  %v877_v52 = vstv %s986_s12  ;;  %v872_v57 = vadd.f32 %v868_v6, %v862_v24  ;;  %v873_v38 = vadd.f32 %v869_v28, %v863_v31 }
  0xcf   :  { %v874_v15 = vadd.f32 %v870_v29, %v864_v36  ;;  %v875_v3 = vadd.f32 %v871_v41, %v865_v5  ;;  %v846_v53 = vsel %vm838_vm0, 17, %v802_v62  ;;  %v847_v40 = vsel %vm839_vm1, 17, %v803_v13 }
  0xd0   :  { %v848_v47 = vsel %vm840_vm2, 17, %v804_v58  ;;  %v849_v59 = vsel %vm841_vm3, 17, %v805_v4  ;;  %v878_v1 = vadd.f32 %v877_v52, %v872_v57  ;;  %v879_v56 = vadd.f32 %v877_v52, %v873_v38 }
  0xd1   :  { %v880_v60 = vadd.f32 %v877_v52, %v874_v15  ;;  %v881_v61 = vadd.f32 %v877_v52, %v875_v3 }
  0xd2   :  { %vm882_vm4 = vcmp.gt.f32.partialorder %v878_v1, %v842_v63  ;;  %vm883_vm5 = vcmp.gt.f32.partialorder %v879_v56, %v843_v39 }
  0xd3   :  { %vm884_vm6 = vcmp.gt.f32.partialorder %v880_v60, %v844_v34  ;;  %vm885_vm7 = vcmp.gt.f32.partialorder %v881_v61, %v845_v49  ;;  %v886_v8 = vsel %vm882_vm4, 18, %v846_v53  ;;  %v887_v50 = vsel %vm883_vm5, 18, %v847_v40 }
  0xd4   :  { %v888_v43 = vsel %vm884_vm6, 18, %v848_v47  ;;  %v889_v51 = vsel %vm885_vm7, 18, %v849_v59  ;;  %v890_v30 = vpack.c.b16 %v887_v50, %v886_v8 }
  0xd5   :  { %v891_v44 = vpack.c.b16 %v889_v51, %v888_v43 }
  0xd7   :  { %v892_v45 = vpack.c.b8 %v891_v44, %v890_v30 }
  0xd9   :  { %893 = vst [vmem:[#allocation9] sm:$0xff] %v892_v45 }
  0xda   :  { %904 = dma.vmem_to_hbm [thread:$0]  %s900_s14, 128, %s902_s17, [#allocation4]  }
  0xdb   :  { %1084 = dma.done.wait [#allocation4], 128  }
  0xdc   :  { %1085 = vsyncadd [#allocation4], 4294967168 }
  0xdd   :  { %909 = vsyncpa [#allocation3], 1 }
  0xde   :  { %910 = vsyncpa [#allocation4], 1 }
  0xdf   :  { %911 = vsyncpa [#allocation5], 1 }
  0xe0   :  { %912 = vsyncpa [#allocation7], 1 }

</bundles_post_ra>
